<compile_context>
chip_gen: v5e
topology: v5e:2x2
jax: 0.10.0
libtpu: 0.0.40
codegen_flags: <defaults>
</compile_context>

<pallas_src>
import functools
import math

import jax
import jax.numpy as jnp
from jax import lax
from jax.experimental import pallas as pl
from jax.experimental.pallas import tpu as pltpu


def _round_up(v, m):
    return (v + m - 1) // m * m


def _aam_softmax_kernel(x_ref, w_ref, lab_ref, out_ref,
                        m_sc, l_sc, t_sc, idx_sc, *,
                        n_class, tc, scale, cos_m, sin_m, threshold, mm,
                        precision):
    j = pl.program_id(1)

    @pl.when(j == 0)
    def _():
        m_sc[...] = jnp.full_like(m_sc, -jnp.inf)   # running row max
        l_sc[...] = jnp.zeros_like(l_sc)            # running exp-sum
        t_sc[...] = jnp.zeros_like(t_sc)            # target (label-column) logit
        idx_sc[...] = jnp.zeros_like(idx_sc)        # running first-argmax index

    lab = lab_ref[...]                              # (TB, 1) int32; padded rows = -1

    # Inputs are pre-normalized / pre-cast in the wrapper; f32 accumulation on MXU.
    cosine = lax.dot_general(x_ref[...], w_ref[...],
                             (((1,), (0,)), ((), ())),
                             preferred_element_type=jnp.float32,
                             precision=precision)   # (TB, TC)

    col = lax.broadcasted_iota(jnp.int32, cosine.shape, 1) + j * tc
    onehot = col == lab                             # true only in the label's class tile

    # Additive-angular margin restricted to the (TB, 1) label column.
    cos_lab = jnp.sum(jnp.where(onehot, cosine, 0.0), axis=-1, keepdims=True)
    sin_lab = jnp.sqrt(jnp.clip(1.0 - cos_lab * cos_lab, 0.0, 1.0))
    phi = cos_lab * cos_m - sin_lab * sin_m
    phi = jnp.where(cos_lab - threshold > 0, phi, cos_lab - mm)

    logits = jnp.where(onehot, phi, cosine) * scale
    logits = jnp.where(col < n_class, logits, -1e30)   # mask padded classes

    # Streaming LSE + running (value, first-index) max across class tiles.
    tile_max = jnp.max(logits, axis=-1, keepdims=True)
    tile_arg = jnp.min(jnp.where(logits == tile_max, col, 2147483647),
                       axis=-1, keepdims=True)         # first maximal column in tile

    m_prev = m_sc[...]
    m_new = jnp.maximum(m_prev, tile_max)
    l_sc[...] = (l_sc[...] * jnp.exp(m_prev - m_new)
                 + jnp.sum(jnp.exp(logits - m_new), axis=-1, keepdims=True))
    idx_sc[...] = jnp.where(tile_max > m_prev, tile_arg, idx_sc[...])
    m_sc[...] = m_new
    t_sc[...] = t_sc[...] + jnp.sum(jnp.where(onehot, logits, 0.0),
                                    axis=-1, keepdims=True)

    @pl.when(j == pl.num_programs(1) - 1)
    def _():
        row_loss = m_sc[...] + jnp.log(l_sc[...]) - t_sc[...]   # (TB, 1)
        valid = lab >= 0                                        # real (non-padded) rows
        correct = idx_sc[...] == lab
        loss_part = jnp.sum(jnp.where(valid, row_loss, 0.0))
        corr_part = jnp.sum(jnp.where(valid & correct, 1.0, 0.0))
        sub = lax.broadcasted_iota(jnp.int32, out_ref.shape, 0)
        lane = lax.broadcasted_iota(jnp.int32, out_ref.shape, 1)
        out_ref[...] = jnp.where((sub == 0) & (lane == 0), loss_part,
                                 jnp.where((sub == 0) & (lane == 1), corr_part, 0.0))


def aam_softmax_loss(x, weight, label, margin, scale, *,
                     matmul_dtype=jnp.bfloat16, block_rows=128, block_cols=1024,
                     f32_precision=lax.Precision.HIGHEST):
    """AAM-Softmax forward. x: (B, D) f32, weight: (C, D) f32, label: (B,) int.
    Returns (loss, prec1) like the PyTorch module."""
    x = jnp.asarray(x, jnp.float32)
    weight = jnp.asarray(weight, jnp.float32)
    label = jnp.asarray(label, jnp.int32)
    b, d = x.shape
    c, dw = weight.shape
    assert d == dw and label.shape == (b,)

    row_align = 16 if matmul_dtype == jnp.bfloat16 else 8
    tb = _round_up(min(block_rows, _round_up(b, row_align)), row_align)
    b_pad = _round_up(b, tb)
    d_pad = _round_up(d, 128)
    tc = min(_round_up(block_cols, 128), _round_up(c, 128))
    c_pad = _round_up(c, tc)
    num_row_tiles = b_pad // tb
    num_col_tiles = c_pad // tc

    # Hoisted prep (once per call, not per batch tile): L2-normalize rows
    # (== F.normalize with eps=1e-12 on the norm), cast to the MXU input dtype,
    # and lay the weight out (D, C) so the class axis is lane-dense.
    x_n = x * lax.rsqrt(jnp.maximum(jnp.sum(x * x, -1, keepdims=True), 1e-24))
    w_n = weight * lax.rsqrt(jnp.maximum(jnp.sum(weight * weight, -1, keepdims=True),
                                         1e-24))
    x_p = jnp.zeros((b_pad, d_pad), matmul_dtype).at[:b, :d].set(
        x_n.astype(matmul_dtype))
    w_p = jnp.zeros((d_pad, c_pad), matmul_dtype).at[:d, :c].set(
        w_n.T.astype(matmul_dtype))
    lab_p = jnp.full((b_pad, 1), -1, jnp.int32).at[:b, 0].set(label)

    kernel = functools.partial(
        _aam_softmax_kernel,
        n_class=c,
        tc=tc,
        scale=float(scale),
        cos_m=math.cos(margin),
        sin_m=math.sin(margin),
        threshold=math.cos(math.pi - margin),
        mm=math.sin(math.pi - margin) * margin,
        precision=f32_precision if matmul_dtype == jnp.float32 else None,
    )

    partials = pl.pallas_call(
        kernel,
        out_shape=jax.ShapeDtypeStruct((num_row_tiles * 8, 128), jnp.float32),
        grid=(num_row_tiles, num_col_tiles),
        in_specs=[
            pl.BlockSpec((tb, d_pad), lambda i, j: (i, 0)),    # x row tile
            pl.BlockSpec((d_pad, tc), lambda i, j: (0, j)),    # weight class tile
            pl.BlockSpec((tb, 1), lambda i, j: (i, 0)),        # label row tile
        ],
        out_specs=pl.BlockSpec((8, 128), lambda i, j: (i, 0)),  # per-row-tile partials
        scratch_shapes=[
            pltpu.VMEM((tb, 1), jnp.float32),   # running max
            pltpu.VMEM((tb, 1), jnp.float32),   # running exp-sum
            pltpu.VMEM((tb, 1), jnp.float32),   # target logit
            pltpu.VMEM((tb, 1), jnp.int32),     # running argmax index
        ],
        compiler_params=pltpu.CompilerParams(
            dimension_semantics=("parallel", "arbitrary"),
            vmem_limit_bytes=56 * 1024 * 1024,
        ),
    )(x_p, w_p, lab_p)

    loss = jnp.sum(partials[:, 0]) / b
    prec1 = 100.0 * jnp.sum(partials[:, 1]) / b
    return loss, prec1


def aam_softmax_reference(x, weight, label, margin, scale):
    """Pure-JAX reference mirroring the PyTorch forward."""
    x_n = x / jnp.maximum(jnp.linalg.norm(x, axis=-1, keepdims=True), 1e-12)
    w_n = weight / jnp.maximum(jnp.linalg.norm(weight, axis=-1, keepdims=True), 1e-12)
    cosine = jnp.dot(x_n, w_n.T, precision=lax.Precision.HIGHEST)
    sine = jnp.sqrt(jnp.clip(1.0 - cosine * cosine, 0.0, 1.0))
    phi = cosine * math.cos(margin) - sine * math.sin(margin)
    phi = jnp.where(cosine - math.cos(math.pi - margin) > 0,
                    phi, cosine - math.sin(math.pi - margin) * margin)
    one_hot = jax.nn.one_hot(label, weight.shape[0], dtype=cosine.dtype)
    output = (one_hot * phi + (1.0 - one_hot) * cosine) * float(scale)
    logp = jax.nn.log_softmax(output, axis=-1)
    b = x.shape[0]
    loss = -jnp.mean(logp[jnp.arange(b), label])
    # TODO(synk): torch.topk tie-order on exactly-equal logits is unspecified;
    # kernel matches jnp.argmax (first maximal column).
    prec1 = 100.0 * jnp.mean((jnp.argmax(output, axis=-1) == label)
                             .astype(jnp.float32))
    return loss, prec1


if __name__ == "__main__":
    margin, scale = 0.2, 30
    batch, dim = 16, 512            # embedding dim fixed at 512 by the module

    key = jax.random.PRNGKey(0)
    kw, kx, kl, kw2, kl2 = jax.random.split(key, 5)

    # --- small class count (single class tile) ---
    n_class = 10
    w_std = math.sqrt(2.0 / (n_class + dim))   # xavier_normal_ std
    weight = w_std * jax.random.normal(kw, (n_class, dim), jnp.float32)
    x = jax.random.normal(kx, (batch, dim), jnp.float32)
    label = jax.random.randint(kl, (batch,), 0, n_class, dtype=jnp.int32)

    ref_loss, ref_prec = aam_softmax_reference(x, weight, label, margin, scale)

    # Exact f32 MXU path (block_rows=8 -> 2 row tiles, exercises the row grid).
    loss32, prec32 = aam_softmax_loss(x, weight, label, margin, scale,
                                      matmul_dtype=jnp.float32, block_rows=8)
    jax.block_until_ready((loss32, prec32))
    assert jnp.allclose(loss32, ref_loss, rtol=1e-3, atol=1e-3), (loss32, ref_loss)
    assert abs(float(prec32) - float(ref_prec)) < 1e-3, (prec32, ref_prec)

    # Fast bf16-input MXU path (recommended default); bf16-appropriate tolerance.
    loss16, prec16 = aam_softmax_loss(x, weight, label, margin, scale,
                                      matmul_dtype=jnp.bfloat16, block_rows=8)
    jax.block_until_ready((loss16, prec16))
    assert jnp.allclose(loss16, ref_loss, rtol=5e-2, atol=5e-2), (loss16, ref_loss)

    # --- larger class count: exercises multi-tile streaming LSE over classes ---
    n_class2 = 300
    w_std2 = math.sqrt(2.0 / (n_class2 + dim))
    weight2 = w_std2 * jax.random.normal(kw2, (n_class2, dim), jnp.float32)
    label2 = jax.random.randint(kl2, (batch,), 0, n_class2, dtype=jnp.int32)
    ref_loss2, ref_prec2 = aam_softmax_reference(x, weight2, label2, margin, scale)
    loss32b, prec32b = aam_softmax_loss(x, weight2, label2, margin, scale,
                                        matmul_dtype=jnp.float32,
                                        block_rows=8, block_cols=128)
    jax.block_until_ready((loss32b, prec32b))
    assert jnp.allclose(loss32b, ref_loss2, rtol=1e-3, atol=1e-3), (loss32b, ref_loss2)
    assert abs(float(prec32b) - float(ref_prec2)) < 1e-3, (prec32b, ref_prec2)

    print("KERNEL_OK")
</pallas_src>

<mosaic_0001>
module attributes {stable_mosaic.version = 11 : i64} {
  func.func @_aam_softmax_kernel(%arg0: i32, %arg1: i32, %arg2: memref<8x512xf32, #tpu.memory_space<vmem>>, %arg3: memref<512x128xf32, #tpu.memory_space<vmem>>, %arg4: memref<8x1xi32, #tpu.memory_space<vmem>>, %arg5: memref<8x128xf32, #tpu.memory_space<vmem>>, %arg6: memref<8x1xf32, #tpu.memory_space<vmem>>, %arg7: memref<8x1xf32, #tpu.memory_space<vmem>>, %arg8: memref<8x1xf32, #tpu.memory_space<vmem>>, %arg9: memref<8x1xi32, #tpu.memory_space<vmem>>) attributes {dimension_semantics = [#tpu.dimension_semantics<parallel>, #tpu.dimension_semantics<arbitrary>], iteration_bounds = array<i64: 2, 1>, scalar_prefetch = 0 : i64, scratch_operands = 4 : i64, tpu.core_type = #tpu.core_type<tc>, window_params = [{transform_indices = @transform_0, window_bounds = array<i64: 8, 512>}, {transform_indices = @transform_1, window_bounds = array<i64: 512, 128>}, {transform_indices = @transform_2, window_bounds = array<i64: 8, 1>}, {transform_indices = @transform_3, window_bounds = array<i64: 8, 128>}]} {
    %c0_i32 = arith.constant 0 : i32
    %0 = arith.cmpi eq, %arg1, %c0_i32 : i32
    %1 = arith.extui %0 : i1 to i32
    %c0_i32_0 = arith.constant 0 : i32
    %2 = arith.cmpi ne, %1, %c0_i32_0 : i32
    scf.if %2 {
      %cst_41 = arith.constant 0xFF800000 : f32
      %82 = vector.broadcast %cst_41 : f32 to vector<8x1xf32>
      %c0_42 = arith.constant 0 : index
      %c0_43 = arith.constant 0 : index
      %83 = vector.load %arg6[%c0_42, %c0_43] : memref<8x1xf32, #tpu.memory_space<vmem>>, vector<8x1xf32>
      tpu.vector_store %arg6[%c0_42, %c0_43], %82 {strides = array<i32>} : memref<8x1xf32, #tpu.memory_space<vmem>>, vector<8x1xf32>,
      %cst_44 = arith.constant 0.000000e+00 : f32
      %84 = vector.broadcast %cst_44 : f32 to vector<8x1xf32>
      %c0_45 = arith.constant 0 : index
      %c0_46 = arith.constant 0 : index
      %85 = vector.load %arg7[%c0_45, %c0_46] : memref<8x1xf32, #tpu.memory_space<vmem>>, vector<8x1xf32>
      tpu.vector_store %arg7[%c0_45, %c0_46], %84 {strides = array<i32>} : memref<8x1xf32, #tpu.memory_space<vmem>>, vector<8x1xf32>,
      %cst_47 = arith.constant 0.000000e+00 : f32
      %86 = vector.broadcast %cst_47 : f32 to vector<8x1xf32>
      %c0_48 = arith.constant 0 : index
      %c0_49 = arith.constant 0 : index
      %87 = vector.load %arg8[%c0_48, %c0_49] : memref<8x1xf32, #tpu.memory_space<vmem>>, vector<8x1xf32>
      tpu.vector_store %arg8[%c0_48, %c0_49], %86 {strides = array<i32>} : memref<8x1xf32, #tpu.memory_space<vmem>>, vector<8x1xf32>,
      %c0_i32_50 = arith.constant 0 : i32
      %88 = vector.broadcast %c0_i32_50 : i32 to vector<8x1xi32>
      %c0_51 = arith.constant 0 : index
      %c0_52 = arith.constant 0 : index
      %89 = vector.load %arg9[%c0_51, %c0_52] : memref<8x1xi32, #tpu.memory_space<vmem>>, vector<8x1xi32>
      tpu.vector_store %arg9[%c0_51, %c0_52], %88 {strides = array<i32>} : memref<8x1xi32, #tpu.memory_space<vmem>>, vector<8x1xi32>,
    } else {
    }
    %c0 = arith.constant 0 : index
    %c0_1 = arith.constant 0 : index
    %3 = vector.load %arg4[%c0, %c0_1] : memref<8x1xi32, #tpu.memory_space<vmem>>, vector<8x1xi32>
    %c0_2 = arith.constant 0 : index
    %c0_3 = arith.constant 0 : index
    %4 = vector.load %arg2[%c0_2, %c0_3] : memref<8x512xf32, #tpu.memory_space<vmem>>, vector<8x512xf32>
    %c0_4 = arith.constant 0 : index
    %c0_5 = arith.constant 0 : index
    %5 = vector.load %arg3[%c0_4, %c0_5] : memref<512x128xf32, #tpu.memory_space<vmem>>, vector<512x128xf32>
    %cst = arith.constant dense<0.000000e+00> : vector<8x128xf32>
    %6 = tpu.matmul %4, %5, %cst {dimension_numbers = #tpu.dot_dimension_numbers<[1], [0], [0], [1], [0, 0, 1, 1], [], []>, precision = #tpu.contract_precision<fp32>} : vector<8x512xf32>, vector<512x128xf32>, vector<8x128xf32> -> vector<8x128xf32>
    %7 = tpu.iota {dimensions = array<i32: 1>} : vector<8x128xi32>
    %c128_i32 = arith.constant 128 : i32
    %8 = arith.muli %arg1, %c128_i32 : i32
    %9 = vector.broadcast %8 : i32 to vector<8x128xi32>
    %10 = arith.addi %7, %9 : vector<8x128xi32>
    %11 = vector.broadcast %3 : vector<8x1xi32> to vector<8x128xi32>
    %12 = arith.cmpi eq, %10, %11 : vector<8x128xi32>
    %cst_6 = arith.constant 0.000000e+00 : f32
    %13 = vector.broadcast %cst_6 : f32 to vector<8x128xf32>
    %14 = arith.select %12, %6, %13 : vector<8x128xi1>, vector<8x128xf32>
    %cst_7 = arith.constant dense<0.000000e+00> : vector<8xf32>
    %15 = vector.multi_reduction <add>, %14, %cst_7 [1] : vector<8x128xf32> to vector<8xf32>
    %16 = vector.shape_cast %15 : vector<8xf32> to vector<8x1xf32>
    %17 = arith.mulf %16, %16 : vector<8x1xf32>
    %cst_8 = arith.constant 1.000000e+00 : f32
    %18 = vector.broadcast %cst_8 : f32 to vector<8x1xf32>
    %19 = arith.subf %18, %17 : vector<8x1xf32>
    %cst_9 = arith.constant 0.000000e+00 : f32
    %cst_10 = arith.constant 1.000000e+00 : f32
    %20 = vector.broadcast %cst_9 : f32 to vector<8x1xf32>
    %21 = arith.maximumf %20, %19 : vector<8x1xf32>
    %22 = vector.broadcast %cst_10 : f32 to vector<8x1xf32>
    %23 = arith.minimumf %22, %21 : vector<8x1xf32>
    %24 = math.sqrt %23 : vector<8x1xf32>
    %cst_11 = arith.constant 0.980066597 : f32
    %25 = vector.broadcast %cst_11 : f32 to vector<8x1xf32>
    %26 = arith.mulf %16, %25 : vector<8x1xf32>
    %cst_12 = arith.constant 0.198669329 : f32
    %27 = vector.broadcast %cst_12 : f32 to vector<8x1xf32>
    %28 = arith.mulf %24, %27 : vector<8x1xf32>
    %29 = arith.subf %26, %28 : vector<8x1xf32>
    %cst_13 = arith.constant -0.980066597 : f32
    %30 = vector.broadcast %cst_13 : f32 to vector<8x1xf32>
    %31 = arith.subf %16, %30 : vector<8x1xf32>
    %cst_14 = arith.constant 0.000000e+00 : f32
    %32 = vector.broadcast %cst_14 : f32 to vector<8x1xf32>
    %33 = arith.cmpf ogt, %31, %32 : vector<8x1xf32>
    %cst_15 = arith.constant 0.0397338644 : f32
    %34 = vector.broadcast %cst_15 : f32 to vector<8x1xf32>
    %35 = arith.subf %16, %34 : vector<8x1xf32>
    %36 = arith.select %33, %29, %35 : vector<8x1xi1>, vector<8x1xf32>
    %37 = vector.shape_cast %36 : vector<8x1xf32> to vector<8x1xf32>
    %38 = vector.broadcast %37 : vector<8x1xf32> to vector<8x128xf32>
    %39 = arith.select %12, %38, %6 : vector<8x128xi1>, vector<8x128xf32>
    %cst_16 = arith.constant 3.000000e+01 : f32
    %40 = vector.broadcast %cst_16 : f32 to vector<8x128xf32>
    %41 = arith.mulf %39, %40 : vector<8x128xf32>
    %c10_i32 = arith.constant 10 : i32
    %42 = vector.broadcast %c10_i32 : i32 to vector<8x128xi32>
    %43 = arith.cmpi slt, %10, %42 : vector<8x128xi32>
    %cst_17 = arith.constant -1.000000e+30 : f32
    %44 = vector.broadcast %cst_17 : f32 to vector<8x128xf32>
    %45 = arith.select %43, %41, %44 : vector<8x128xi1>, vector<8x128xf32>
    %cst_18 = arith.constant dense<0xFF800000> : vector<8xf32>
    %46 = vector.multi_reduction <maximumf>, %45, %cst_18 [1] : vector<8x128xf32> to vector<8xf32>
    %47 = vector.shape_cast %46 : vector<8xf32> to vector<8x1xf32>
    %48 = vector.broadcast %47 : vector<8x1xf32> to vector<8x128xf32>
    %49 = arith.cmpf oeq, %45, %48 : vector<8x128xf32>
    %c2147483647_i32 = arith.constant 2147483647 : i32
    %50 = vector.broadcast %c2147483647_i32 : i32 to vector<8x128xi32>
    %51 = arith.select %49, %10, %50 : vector<8x128xi1>, vector<8x128xi32>
    %cst_19 = arith.constant dense<2147483647> : vector<8xi32>
    %52 = vector.multi_reduction <minsi>, %51, %cst_19 [1] : vector<8x128xi32> to vector<8xi32>
    %53 = vector.shape_cast %52 : vector<8xi32> to vector<8x1xi32>
    %c0_20 = arith.constant 0 : index
    %c0_21 = arith.constant 0 : index
    %54 = vector.load %arg6[%c0_20, %c0_21] : memref<8x1xf32, #tpu.memory_space<vmem>>, vector<8x1xf32>
    %55 = arith.maximumf %54, %47 : vector<8x1xf32>
    %c0_22 = arith.constant 0 : index
    %c0_23 = arith.constant 0 : index
    %56 = vector.load %arg7[%c0_22, %c0_23] : memref<8x1xf32, #tpu.memory_space<vmem>>, vector<8x1xf32>
    %57 = arith.subf %54, %55 : vector<8x1xf32>
    %58 = math.exp %57 : vector<8x1xf32>
    %59 = arith.mulf %56, %58 : vector<8x1xf32>
    %60 = vector.broadcast %55 : vector<8x1xf32> to vector<8x128xf32>
    %61 = arith.subf %45, %60 : vector<8x128xf32>
    %62 = math.exp %61 : vector<8x128xf32>
    %cst_24 = arith.constant dense<0.000000e+00> : vector<8xf32>
    %63 = vector.multi_reduction <add>, %62, %cst_24 [1] : vector<8x128xf32> to vector<8xf32>
    %64 = vector.shape_cast %63 : vector<8xf32> to vector<8x1xf32>
    %65 = arith.addf %59, %64 : vector<8x1xf32>
    %c0_25 = arith.constant 0 : index
    %c0_26 = arith.constant 0 : index
    %66 = vector.load %arg7[%c0_25, %c0_26] : memref<8x1xf32, #tpu.memory_space<vmem>>, vector<8x1xf32>
    tpu.vector_store %arg7[%c0_25, %c0_26], %65 {strides = array<i32>} : memref<8x1xf32, #tpu.memory_space<vmem>>, vector<8x1xf32>,
    %67 = arith.cmpf ogt, %47, %54 : vector<8x1xf32>
    %c0_27 = arith.constant 0 : index
    %c0_28 = arith.constant 0 : index
    %68 = vector.load %arg9[%c0_27, %c0_28] : memref<8x1xi32, #tpu.memory_space<vmem>>, vector<8x1xi32>
    %69 = arith.select %67, %53, %68 : vector<8x1xi1>, vector<8x1xi32>
    %c0_29 = arith.constant 0 : index
    %c0_30 = arith.constant 0 : index
    %70 = vector.load %arg9[%c0_29, %c0_30] : memref<8x1xi32, #tpu.memory_space<vmem>>, vector<8x1xi32>
    tpu.vector_store %arg9[%c0_29, %c0_30], %69 {strides = array<i32>} : memref<8x1xi32, #tpu.memory_space<vmem>>, vector<8x1xi32>,
    %c0_31 = arith.constant 0 : index
    %c0_32 = arith.constant 0 : index
    %71 = vector.load %arg6[%c0_31, %c0_32] : memref<8x1xf32, #tpu.memory_space<vmem>>, vector<8x1xf32>
    tpu.vector_store %arg6[%c0_31, %c0_32], %55 {strides = array<i32>} : memref<8x1xf32, #tpu.memory_space<vmem>>, vector<8x1xf32>,
    %c0_33 = arith.constant 0 : index
    %c0_34 = arith.constant 0 : index
    %72 = vector.load %arg8[%c0_33, %c0_34] : memref<8x1xf32, #tpu.memory_space<vmem>>, vector<8x1xf32>
    %cst_35 = arith.constant 0.000000e+00 : f32
    %73 = vector.broadcast %cst_35 : f32 to vector<8x128xf32>
    %74 = arith.select %12, %45, %73 : vector<8x128xi1>, vector<8x128xf32>
    %cst_36 = arith.constant dense<0.000000e+00> : vector<8xf32>
    %75 = vector.multi_reduction <add>, %74, %cst_36 [1] : vector<8x128xf32> to vector<8xf32>
    %76 = vector.shape_cast %75 : vector<8xf32> to vector<8x1xf32>
    %77 = arith.addf %72, %76 : vector<8x1xf32>
    %c0_37 = arith.constant 0 : index
    %c0_38 = arith.constant 0 : index
    %78 = vector.load %arg8[%c0_37, %c0_38] : memref<8x1xf32, #tpu.memory_space<vmem>>, vector<8x1xf32>
    tpu.vector_store %arg8[%c0_37, %c0_38], %77 {strides = array<i32>} : memref<8x1xf32, #tpu.memory_space<vmem>>, vector<8x1xf32>,
    %c0_i32_39 = arith.constant 0 : i32
    %79 = arith.cmpi eq, %arg1, %c0_i32_39 : i32
    %80 = arith.extui %79 : i1 to i32
    %c0_i32_40 = arith.constant 0 : i32
    %81 = arith.cmpi ne, %80, %c0_i32_40 : i32
    scf.if %81 {
      %c0_41 = arith.constant 0 : index
      %c0_42 = arith.constant 0 : index
      %82 = vector.load %arg6[%c0_41, %c0_42] : memref<8x1xf32, #tpu.memory_space<vmem>>, vector<8x1xf32>
      %c0_43 = arith.constant 0 : index
      %c0_44 = arith.constant 0 : index
      %83 = vector.load %arg7[%c0_43, %c0_44] : memref<8x1xf32, #tpu.memory_space<vmem>>, vector<8x1xf32>
      %84 = math.log %83 : vector<8x1xf32>
      %85 = arith.addf %82, %84 : vector<8x1xf32>
      %c0_45 = arith.constant 0 : index
      %c0_46 = arith.constant 0 : index
      %86 = vector.load %arg8[%c0_45, %c0_46] : memref<8x1xf32, #tpu.memory_space<vmem>>, vector<8x1xf32>
      %87 = arith.subf %85, %86 : vector<8x1xf32>
      %c0_i32_47 = arith.constant 0 : i32
      %88 = vector.broadcast %c0_i32_47 : i32 to vector<8x1xi32>
      %89 = arith.cmpi sge, %3, %88 : vector<8x1xi32>
      %c0_48 = arith.constant 0 : index
      %c0_49 = arith.constant 0 : index
      %90 = vector.load %arg9[%c0_48, %c0_49] : memref<8x1xi32, #tpu.memory_space<vmem>>, vector<8x1xi32>
      %91 = arith.cmpi eq, %90, %3 : vector<8x1xi32>
      %cst_50 = arith.constant 0.000000e+00 : f32
      %92 = vector.broadcast %cst_50 : f32 to vector<8x1xf32>
      %93 = arith.select %89, %87, %92 : vector<8x1xi1>, vector<8x1xf32>
      %94 = vector.shape_cast %93 : vector<8x1xf32> to vector<1x8x1xf32>
      %cst_51 = arith.constant dense<0.000000e+00> : vector<1xf32>
      %95 = vector.multi_reduction <add>, %94, %cst_51 [1, 2] : vector<1x8x1xf32> to vector<1xf32>
      %96 = vector.shape_cast %95 : vector<1xf32> to vector<1x1x1xf32>
      %97 = vector.extract %96[0, 0, 0] : f32 from vector<1x1x1xf32>
      %98 = arith.andi %89, %91 : vector<8x1xi1>
      %cst_52 = arith.constant 1.000000e+00 : f32
      %cst_53 = arith.constant 0.000000e+00 : f32
      %99 = vector.broadcast %cst_52 : f32 to vector<8x1xf32>
      %100 = vector.broadcast %cst_53 : f32 to vector<8x1xf32>
      %101 = arith.select %98, %99, %100 : vector<8x1xi1>, vector<8x1xf32>
      %102 = vector.shape_cast %101 : vector<8x1xf32> to vector<1x8x1xf32>
      %cst_54 = arith.constant dense<0.000000e+00> : vector<1xf32>
      %103 = vector.multi_reduction <add>, %102, %cst_54 [1, 2] : vector<1x8x1xf32> to vector<1xf32>
      %104 = vector.shape_cast %103 : vector<1xf32> to vector<1x1x1xf32>
      %105 = vector.extract %104[0, 0, 0] : f32 from vector<1x1x1xf32>
      %106 = tpu.iota {dimensions = array<i32: 0>} : vector<8x128xi32>
      %107 = tpu.iota {dimensions = array<i32: 1>} : vector<8x128xi32>
      %c0_i32_55 = arith.constant 0 : i32
      %108 = vector.broadcast %c0_i32_55 : i32 to vector<8x128xi32>
      %109 = arith.cmpi eq, %106, %108 : vector<8x128xi32>
      %c0_i32_56 = arith.constant 0 : i32
      %110 = vector.broadcast %c0_i32_56 : i32 to vector<8x128xi32>
      %111 = arith.cmpi eq, %107, %110 : vector<8x128xi32>
      %112 = arith.andi %109, %111 : vector<8x128xi1>
      %c0_i32_57 = arith.constant 0 : i32
      %113 = vector.broadcast %c0_i32_57 : i32 to vector<8x128xi32>
      %114 = arith.cmpi eq, %106, %113 : vector<8x128xi32>
      %c1_i32 = arith.constant 1 : i32
      %115 = vector.broadcast %c1_i32 : i32 to vector<8x128xi32>
      %116 = arith.cmpi eq, %107, %115 : vector<8x128xi32>
      %117 = arith.andi %114, %116 : vector<8x128xi1>
      %cst_58 = arith.constant 0.000000e+00 : f32
      %118 = vector.broadcast %105 : f32 to vector<8x128xf32>
      %119 = vector.broadcast %cst_58 : f32 to vector<8x128xf32>
      %120 = arith.select %117, %118, %119 : vector<8x128xi1>, vector<8x128xf32>
      %121 = vector.broadcast %97 : f32 to vector<8x128xf32>
      %122 = arith.select %112, %121, %120 : vector<8x128xi1>, vector<8x128xf32>
      %c0_59 = arith.constant 0 : index
      %c0_60 = arith.constant 0 : index
      %123 = vector.load %arg5[%c0_59, %c0_60] : memref<8x128xf32, #tpu.memory_space<vmem>>, vector<8x128xf32>
      tpu.vector_store %arg5[%c0_59, %c0_60], %122 {strides = array<i32>} : memref<8x128xf32, #tpu.memory_space<vmem>>, vector<8x128xf32>,
    } else {
    }
    return
  }
  func.func @transform_0(%arg0: i32, %arg1: i32) -> (i32, i32) {
    %c0_i32 = arith.constant 0 : i32
    %c0_i32_0 = arith.constant 0 : i32
    return %arg0, %c0_i32 : i32, i32
  }
  func.func @transform_1(%arg0: i32, %arg1: i32) -> (i32, i32) {
    %c0_i32 = arith.constant 0 : i32
    %c0_i32_0 = arith.constant 0 : i32
    return %c0_i32, %arg1 : i32, i32
  }
  func.func @transform_2(%arg0: i32, %arg1: i32) -> (i32, i32) {
    %c0_i32 = arith.constant 0 : i32
    %c0_i32_0 = arith.constant 0 : i32
    return %arg0, %c0_i32 : i32, i32
  }
  func.func @transform_3(%arg0: i32, %arg1: i32) -> (i32, i32) {
    %c0_i32 = arith.constant 0 : i32
    %c0_i32_0 = arith.constant 0 : i32
    return %arg0, %c0_i32 : i32, i32
  }
}

</mosaic_0001>

<bundles_post_ra>
// kernel: tpu_custom_call.1
= control target key start
LH: loop header
LB: loop body
LE: loop exit
PB: predicated region body
PF: predicated region fallthrough
CT: control target
= control target key end

     0   :  { %8 = vsyncpa [#allocation7], 0  ;;  %s3431_s0 = inlined_call_operand.hbm [shape: f32[16,512], index: 0, kind: input, shape index: {}]   ;;  %s3432_s1 = inlined_call_operand.hbm [shape: f32[512,128], index: 1, kind: input, shape index: {}]   ;;  %s3433_s2 = inlined_call_operand.vmem [shape: s32[16,1], index: 2, kind: input, shape index: {}]   ;;  %s3434_s3 = inlined_call_operand.hbm [shape: f32[16,128], index: 3, kind: output, shape index: {}]  }
   0x1   :  { %10 = vsyncpa [#allocation7 + $0x1], 0 }
   0x2   :  { %11 = vsyncpa [#allocation10], 0 }
   0x3   :  { %12 = vsyncpa [#allocation8], 0 }
   0x4   :  { %14 = vsyncpa [#allocation8 + $0x1], 0  ;;  %s2224_s12 = smov 0   ;;  %s2226_s13 = smov 0  }
   0x5   :  { %s2228_s14 = smov 0   ;;  %s2230_s15 = smov 0  }
   0x6   :  { %s2232_s16 = smov 0   ;;  %s2234_s17 = smov 0  }
   0x7 LB: > { %s1938_s18 = sadd.s32 4294967295, %s2196_s17   ;;  %p1940_p0 = scmp.ge.s32.totalorder %s2196_s17, 1  ;;  %s2196_s17 = sphi %s2234_s17, %s20_s17   ;;  %s2192_s16 = sphi %s2232_s16, %s3550_s16   ;;  %s2188_s15 = sphi %s2230_s15, %s3549_s15   ;;  %s2184_s14 = sphi %s2228_s14, %s3548_s14   ;;  %s2180_s13 = sphi %s2226_s13, %s3547_s13   ;;  %s2176_s12 = sphi %s2224_s12, %s3546_s12  }
   0x8   : > { %p2256_p1 = scmp.eq.s32.totalorder %s1938_s18, 0  ;;  %p141_p2 = scmp.lt.s32.totalorder %s2196_s17, 3 }
   0x9   : > { %s154_s22 = sshll.u32 %s3432_s1, 4  ;;  %s2198_s24 = smov [#allocation9]   ;;  %s155_s22 = int_to_ptr.hbm [resolvable:$true] %s154_s22 }
   0xa   : > { %p2264_p3 = pnand %p1940_p0, %p141_p2  ;;  %s156_s25 = sshll.u32 %s2198_s24, 4  ;;  %s157_s25 = int_to_ptr.vmem [resolvable:$true] %s156_s25 }
   0xb   : > { %p1942_p6 = scmp.ge.s32.totalorder %s2196_s17, 2  ;;  %s2199_s26 = smov 128  }
   0xc   : > { %p1970_p4 = pneg %p2264_p3  ;;  %s2200_s27 = smov 8  }
   0xd   : > { %s1939_s28 = sadd.s32 4294967294, %s2196_s17   ;;  %s32_s29 = sadd.s32 1, %s2192_s16 }
   0xe   : > { %p1971_p5 = pnand %p1970_p4, %p2256_p1  ;;  %s39_s30 = sadd.s32 1, %s2184_s14 }
   0xf   : > { %p34_p7 = scmp.ge.s32.totalorder %s32_s29, 2  ;;  %p46_p8 = scmp.ne.s32.totalorder %s2184_s14, %s2180_s13 }
  0x10   : > { %1973 = dma.hbm_to_vmem [thread:$0]  (!%p1971_p5), %s155_s22, 8192, %s157_s25, [#allocation10], %s2199_s26, %s2199_s26, %s2200_s27  }
  0x11   : > { %p47_p9 = scmp.eq.s32.totalorder %s2196_s17, 0  ;;  %p52_p10 = scmp.ne.s32.totalorder %s2180_s13, %s2176_s12 }
  0x12   : > { %s3552_s29 = smov (%p34_p7, %s32_s29), 0  ;;  %p128_p13 = scmp.eq.s32.totalorder %s1938_s18, 1 }
  0x13   : > { %p2283_p11 = por %p47_p9, %p46_p8  ;;  %p2289_p12 = por %p2256_p1, %p52_p10 }
  0x14   : > { %s36_s6 = ssub.s32 %s2192_s16, %s3552_s29  ;;  %p134_p2 = scmp.eq.s32.totalorder %s1939_s28, 1 }
  0x15   : > { %p37_p0 = scmp.eq.s32.totalorder %s36_s6, 0  ;;  %p2295_p4 = por %p128_p13, %p46_p8 }
  0x16   : > { %p1983_p5 = scmp.lt.s32.totalorder %s2196_s17, 2  ;;  %p2303_p7 = por %p134_p2, %p52_p10 }
  0x17   : > { %s2301_s8 = scalar_select %p37_p0, %s2184_s14, %s39_s30  }
  0x18   : > { %s170_s10 = sand.u32 1, %s2184_s14   ;;  %s1957_s20 = sshll.u32 %s2192_s16, 5 }
  0x19   : > { %s1943_s11 = sshll.u32 %s170_s10, 5  ;;  %s179_s18 = scalar_lea.hbm %s3431_s0, %s1957_s20 }
  0x1a   : > { %s174_s24 = scalar_lea.vmem [#allocation6], %s1943_s11  ;;  %s181_s26 = sshll.u32 %s179_s18, 4  ;;  %s182_s26 = int_to_ptr.hbm [resolvable:$true] %s181_s26 }
  0x1b   : > { %s183_s25 = sshll.u32 %s174_s24, 4  ;;  %p1975_p8 = pnand %p1983_p5, %p2283_p11  ;;  %s184_s25 = int_to_ptr.vmem [resolvable:$true] %s183_s25 }
  0x1c   : > { %s171_s27 = scalar_lea.sflag [#allocation7], %s170_s10  ;;  %199 = sbr.rel (%p2264_p3) target bundleno = 1112 (0x458), region = 32 }
  0x1d   : > { %1977 = dma.hbm_to_vmem [thread:$0]  (!%p1975_p8), %s182_s26, 512, %s184_s25, %s171_s27  }
  0x21   : > { %s2317_s28 = sand.u32 1, %s2180_s13  }
  0x22   : > { %s1947_s30 = sshll.u32 %s2317_s28, 5  ;;  %s202_s6 = scalar_lea.sflag [#allocation7], %s2317_s28 }
  0x23   : > { %s2321_s11 = scalar_lea.vmem [#allocation6], %s1947_s30 }
  0x24   : > { %2163 = dma.done.wait (%p2289_p12), %s202_s6, 512  }
  0x25   : > { %2165 = vsyncadd (%p2289_p12), %s202_s6, 4294966784 }
  0x26   : > { %2167 = dma.done.wait (%p2256_p1), [#allocation10], 8192  }
  0x27   : > { %2169 = vsyncadd (%p2256_p1), [#allocation10], 4294959104  ;;  %v271_v0 = vld [vmem:[#allocation9 + $0x78] sm:$0xff]  ;;  %v270_v1 = vld [vmem:[#allocation9 + $0x70] sm:$0xff]  ;;  %vm246_vm0 = vcmask 7168   ;;  %p238_p1 = scmp.lt.s32.totalorder %s2188_s15, 1 }
  0x28   : > { %v269_v2 = vld [vmem:[#allocation9 + $0x68] sm:$0xff]  ;;  %v2331_v3 = vand.u32 4294901760, %v271_v0  ;;  %v2333_v4 = vand.u32 4294901760, %v270_v1  ;;  %v268_v6 = vld [vmem:[#allocation9 + $0x60] sm:$0xff]  ;;  %v267_v7 = vld [vmem:[#allocation9 + $0x58] sm:$0xff]  ;;  %s1949_s20 = sshll.u32 %s2317_s28, 3 }
  0x29   : > { %v2335_v5 = vand.u32 4294901760, %v269_v2  ;;  %v266_v8 = vld [vmem:[#allocation9 + $0x50] sm:$0xff]  ;;  %v2337_v9 = vand.u32 4294901760, %v268_v6  ;;  %v2339_v10 = vand.u32 4294901760, %v267_v7  ;;  %v265_v12 = vld [vmem:[#allocation9 + $0x48] sm:$0xff]  ;;  %v264_v13 = vld [vmem:[#allocation9 + $0x40] sm:$0xff] }
  0x2a   : > { %v2341_v11 = vand.u32 4294901760, %v266_v8  ;;  %321 = vmatpush.msra.mxu0 %v2331_v3  ;;  %v2345_v14 = vsub.f32 %v271_v0, %v2331_v3  ;;  %v2348_v15 = vsub.f32 %v270_v1, %v2333_v4  ;;  %517 = vmatpush.msra.mxu3 %v2331_v3  ;;  %v2354_v17 = vand.u32 4294901760, %v265_v12  ;;  %v263_v18 = vld [vmem:[#allocation9 + $0x38] sm:$0xff]  ;;  %v262_v26 = vld [vmem:[#allocation9 + $0x30] sm:$0xff]  ;;  %v261_v34 = vld [vmem:[#allocation9 + $0x28] sm:$0xff]  ;;  %s239_s19 = scalar_select %p238_p1, %s2188_s15, 1 }
  0x2b   : > { %v2352_v16 = vsub.f32 %v269_v2, %v2335_v5  ;;  %v2357_v19 = vsub.f32 %v268_v6, %v2337_v9  ;;  %v2360_v20 = vsub.f32 %v267_v7, %v2339_v10  ;;  %v2370_v25 = vand.u32 4294901760, %v264_v13  ;;  %v260_v42 = vld [vmem:[#allocation9 + $0x20] sm:$0xff]  ;;  %v259_v48 = vld [vmem:[#allocation9 + $0x18] sm:$0xff]  ;;  %v258_v54 = vld [vmem:[#allocation9 + $0x10] sm:$0xff]  ;;  %s1954_s21 = sshll.u32 %s2188_s15, 3  ;;  %s237_s25 = scalar_lea.vmem [#allocation11], %s1949_s20 }
  0x2c   : > { %v2363_v21 = vsub.f32 %v266_v8, %v2341_v11  ;;  %323 = vmatpush.msra.mxu0 %v2333_v4  ;;  %464 = vmatpush.msra.mxu2 %v2345_v14  ;;  %v363_v22 = vand.u32 4294901760, %v2345_v14  ;;  %v3450_v23 = vand.u32 4294901760, %v2348_v15  ;;  %v2374_v28 = vand.u32 4294901760, %v263_v18  ;;  %v287_v59 = vld [vmem:[#allocation9 + $0xf8] sm:$0xff]  ;;  %v257_v61 = vld [vmem:[#allocation9 + $0x8] sm:$0xff]  ;;  %v256_v2 = vld [vmem:[#allocation9] sm:$0xff]  ;;  %s1831_s24 = scalar_lea.hbm %s3434_s3, %s1954_s21 }
  0x2d   : > { %v3448_v24 = vand.u32 4294901760, %v2352_v16  ;;  %519 = vmatpush.msra.mxu3 %v2333_v4  ;;  %v3446_v27 = vand.u32 4294901760, %v2357_v19  ;;  %v2377_v29 = vsub.f32 %v265_v12, %v2354_v17  ;;  %v3444_v33 = vand.u32 4294901760, %v2360_v20  ;;  %v286_v6 = vld [vmem:[#allocation9 + $0xf0] sm:$0xff]  ;;  %s1950_s23 = sshll.u32 %s239_s19, 3  ;;  %s1833_s26 = sshll.u32 %s237_s25, 4  ;;  %s1834_s26 = int_to_ptr.vmem [resolvable:$true] %s1833_s26 }
  0x2e   : > { %325 = vmatpush.msra.mxu0 %v2335_v5  ;;  %467 = vmatpush.msra.mxu2 %v2348_v15  ;;  %v364_v30 = vsub.f32 %v2345_v14, %v363_v22  ;;  %v370_v31 = vsub.f32 %v2348_v15, %v3450_v23  ;;  %v2392_v35 = vand.u32 4294901760, %v262_v26  ;;  %v3442_v36 = vand.u32 4294901760, %v2363_v21  ;;  %s241_s10 = scalar_lea.vmem %s3433_s2, %s1950_s23  ;;  %s1835_s30 = sshll.u32 %s1831_s24, 4  ;;  %s1836_s30 = int_to_ptr.hbm [resolvable:$true] %s1835_s30 }
  0x2f   : > { %v376_v32 = vsub.f32 %v2352_v16, %v3448_v24  ;;  %521 = vmatpush.msra.mxu3 %v2335_v5  ;;  %v382_v39 = vsub.f32 %v2357_v19, %v3446_v27  ;;  %v2401_v40 = vsub.f32 %v264_v13, %v2370_v25  ;;  %v2404_v41 = vand.u32 4294901760, %v261_v34  ;;  %s1821_s15 = scalar_lea.sflag [#allocation8], %s2317_s28  ;;  %s2130_s5 = scalar_lea.hbm %s3434_s3, 16 }
  0x30   : > { %327 = vmatpush.msra.mxu0 %v2337_v9  ;;  %v365_v37 = vand.u32 4294901760, %v364_v30  ;;  %470 = vmatpush.msra.mxu2 %v2352_v16  ;;  %v371_v38 = vand.u32 4294901760, %v370_v31  ;;  %v388_v44 = vsub.f32 %v2360_v20, %v3444_v33  ;;  %v3441_v45 = vand.u32 4294901760, %v2377_v29 }
  0x31   : > { %523 = vmatpush.msra.mxu3 %v2337_v9  ;;  %v377_v43 = vand.u32 4294901760, %v376_v32  ;;  %v2412_v46 = vsub.f32 %v263_v18, %v2374_v28  ;;  %v394_v47 = vsub.f32 %v2363_v21, %v3442_v36  ;;  %v383_v49 = vand.u32 4294901760, %v382_v39  ;;  %v285_v32 = vld [vmem:[#allocation9 + $0xe8] sm:$0xff] }
  0x32   : > { %329 = vmatpush.msra.mxu0 %v2339_v10  ;;  %366 = vmatpush.msra.mxu1 %v365_v37  ;;  %v2420_v50 = vand.u32 4294901760, %v260_v42  ;;  %v3440_v51 = vand.u32 4294901760, %v2401_v40  ;;  %v2424_v52 = vsub.f32 %v262_v26, %v2392_v35  ;;  %v2429_v53 = vsub.f32 %v261_v34, %v2404_v41 }
  0x33   : > { %473 = vmatpush.msra.mxu2 %v2357_v19  ;;  %525 = vmatpush.msra.mxu3 %v2339_v10  ;;  %v389_v55 = vand.u32 4294901760, %v388_v44  ;;  %v400_v56 = vsub.f32 %v2377_v29, %v3441_v45  ;;  %v2435_v57 = vand.u32 4294901760, %v259_v48  ;;  %v3439_v58 = vand.u32 4294901760, %v2412_v46  ;;  %v284_v44 = vld [vmem:[#allocation9 + $0xe0] sm:$0xff] }
  0x34   : > { %331 = vmatpush.msra.mxu0 %v2341_v11  ;;  %372 = vmatpush.msra.mxu1 %v371_v38  ;;  %v395_v60 = vand.u32 4294901760, %v394_v47  ;;  %v406_v62 = vsub.f32 %v2401_v40, %v3440_v51  ;;  %v2444_v63 = vand.u32 4294901760, %v258_v54  ;;  %v3437_v0 = vand.u32 4294901760, %v2424_v52  ;;  %v280_v45 = vld [vmem:[#allocation9 + $0xc0] sm:$0xff] }
  0x35   : > { %476 = vmatpush.msra.mxu2 %v2360_v20  ;;  %527 = vmatpush.msra.mxu3 %v2341_v11  ;;  %v2448_v1 = vsub.f32 %v260_v42, %v2420_v50  ;;  %v3436_v7 = vand.u32 4294901760, %v2429_v53  ;;  %v2453_v8 = vand.u32 4294901760, %v287_v59  ;;  %v401_v12 = vand.u32 4294901760, %v400_v56 }
  0x36   : > { %333 = vmatpush.msra.mxu0 %v2354_v17  ;;  %378 = vmatpush.msra.mxu1 %v377_v43  ;;  %v412_v13 = vsub.f32 %v2412_v46, %v3439_v58  ;;  %v2459_v18 = vand.u32 4294901760, %v257_v61  ;;  %v2462_v26 = vsub.f32 %v259_v48, %v2435_v57  ;;  %v2466_v30 = vand.u32 4294901760, %v256_v2 }
  0x37   : > { %479 = vmatpush.msra.mxu2 %v2363_v21  ;;  %529 = vmatpush.msra.mxu3 %v2354_v17  ;;  %v2468_v31 = vand.u32 4294901760, %v286_v6  ;;  %v407_v34 = vand.u32 4294901760, %v406_v62  ;;  %v418_v37 = vsub.f32 %v2424_v52, %v3437_v0  ;;  %v3435_v38 = vand.u32 4294901760, %v2448_v1 }
  0x38   : > { %335 = vmatpush.msra.mxu0 %v2370_v25  ;;  %384 = vmatpush.msra.mxu1 %v383_v49  ;;  %3481 = vst [vmem:[#allocation15_spill] sm:$0xff] %v2466_v30  ;;  %v2476_v39 = vsub.f32 %v258_v54, %v2444_v63  ;;  %v424_v42 = vsub.f32 %v2429_v53, %v3436_v7  ;;  %v413_v47 = vand.u32 4294901760, %v412_v13  ;;  %v3438_v48 = vand.u32 4294901760, %v2462_v26  ;;  %v282_v13 = vld [vmem:[#allocation9 + $0xd0] sm:$0xff] }
  0x39   : > { %482 = vmatpush.msra.mxu2 %v2377_v29  ;;  %531 = vmatpush.msra.mxu3 %v2370_v25  ;;  %v2484_v43 = vsub.f32 %v287_v59, %v2453_v8  ;;  %v2489_v49 = vsub.f32 %v257_v61, %v2459_v18  ;;  %v2491_v54 = vand.u32 4294901760, %v285_v32  ;;  %v2499_v56 = vsub.f32 %v286_v6, %v2468_v31  ;;  %v283_v59 = vld [vmem:[#allocation9 + $0xd8] sm:$0xff] }
  0x3a   : > { %337 = vmatpush.msra.mxu0 %v2374_v28  ;;  %390 = vmatpush.msra.mxu1 %v389_v55  ;;  %v2496_v55 = vsub.f32 %v256_v2, %v2466_v30  ;;  %v430_v61 = vsub.f32 %v2448_v1, %v3435_v38  ;;  %v3443_v62 = vand.u32 4294901760, %v2476_v39  ;;  %v425_v2 = vand.u32 4294901760, %v424_v42  ;;  %v281_v42 = vld [vmem:[#allocation9 + $0xc8] sm:$0xff] }
  0x3b   : > { %485 = vmatpush.msra.mxu2 %v2401_v40  ;;  %533 = vmatpush.msra.mxu3 %v2374_v28  ;;  %v3445_v6 = vand.u32 4294901760, %v2484_v43  ;;  %v2517_v38 = vsub.f32 %v285_v32, %v2491_v54  ;;  %v2519_v7 = vand.u32 4294901760, %v283_v59  ;;  %v2532_v51 = vand.u32 4294901760, %v282_v13 }
  0x3c   : > { %339 = vmatpush.msra.mxu0 %v2392_v35  ;;  %396 = vmatpush.msra.mxu1 %v395_v60  ;;  %v419_v60 = vand.u32 4294901760, %v418_v37  ;;  %v3447_v37 = vand.u32 4294901760, %v2489_v49  ;;  %v3451_v0 = vand.u32 4294901760, %v2496_v55  ;;  %v442_v32 = vsub.f32 %v2476_v39, %v3443_v62 }
  0x3d   : > { %488 = vmatpush.msra.mxu2 %v2412_v46  ;;  %535 = vmatpush.msra.mxu3 %v2392_v35  ;;  %v705_v36 = vsub.f32 %v2484_v43, %v3445_v6  ;;  %v3452_v62 = vand.u32 4294901760, %v2517_v38  ;;  %v2547_v33 = vsub.f32 %v283_v59, %v2519_v7  ;;  %v2554_v27 = vand.u32 4294901760, %v280_v45 }
  0x3e   : > { %341 = vmatpush.msra.mxu0 %v2404_v41  ;;  %402 = vmatpush.msra.mxu1 %v401_v12  ;;  %v2506_v12 = vand.u32 4294901760, %v284_v44  ;;  %v454_v59 = vsub.f32 %v2496_v55, %v3451_v0  ;;  %v2562_v24 = vsub.f32 %v282_v13, %v2532_v51  ;;  %v3482_v14 = vand.u32 4294901760, %v2348_v15 }
  0x3f   : > { %491 = vmatpush.msra.mxu2 %v2424_v52  ;;  %537 = vmatpush.msra.mxu3 %v2404_v41  ;;  %v717_v0 = vsub.f32 %v2517_v38, %v3452_v62  ;;  %v3484_v15 = vand.u32 4294901760, %v2352_v16  ;;  %v3486_v16 = vand.u32 4294901760, %v2357_v19  ;;  %v3488_v19 = vand.u32 4294901760, %v2360_v20 }
  0x40   : > { %343 = vmatpush.msra.mxu0 %v2420_v50  ;;  %408 = vmatpush.msra.mxu1 %v407_v34  ;;  %v436_v34 = vsub.f32 %v2462_v26, %v3438_v48  ;;  %v431_v48 = vand.u32 4294901760, %v430_v61  ;;  %v2530_v58 = vsub.f32 %v284_v44, %v2506_v12  ;;  %v448_v44 = vsub.f32 %v2489_v49, %v3447_v37 }
  0x41   : > { %494 = vmatpush.msra.mxu2 %v2429_v53  ;;  %539 = vmatpush.msra.mxu3 %v2420_v50  ;;  %v3490_v20 = vand.u32 4294901760, %v2363_v21  ;;  %v3492_v21 = vand.u32 4294901760, %v2377_v29  ;;  %v3494_v29 = vand.u32 4294901760, %v2401_v40  ;;  %v3496_v40 = vand.u32 4294901760, %v2412_v46 }
  0x42   : > { %345 = vmatpush.msra.mxu0 %v2435_v57  ;;  %414 = vmatpush.msra.mxu1 %v413_v47  ;;  %v3449_v47 = vand.u32 4294901760, %v2499_v56  ;;  %v437_v61 = vand.u32 4294901760, %v436_v34  ;;  %v443_v34 = vand.u32 4294901760, %v442_v32  ;;  %v449_v32 = vand.u32 4294901760, %v448_v44 }
  0x43   : > { %497 = vmatpush.msra.mxu2 %v2448_v1  ;;  %541 = vmatpush.msra.mxu3 %v2435_v57  ;;  %v3483_v44 = vand.u32 4294901760, %v2530_v58 }
  0x44   : > { %347 = vmatpush.msra.mxu0 %v2444_v63  ;;  %420 = vmatpush.msra.mxu1 %v419_v60  ;;  %v2539_v60 = vand.u32 4294901760, %v281_v42  ;;  %v711_v6 = vsub.f32 %v2499_v56, %v3449_v47  ;;  %v706_v47 = vand.u32 4294901760, %v705_v36  ;;  %v2581_v36 = vsub.f32 %v280_v45, %v2554_v27 }
  0x45   : > { %500 = vmatpush.msra.mxu2 %v2462_v26  ;;  %543 = vmatpush.msra.mxu3 %v2444_v63  ;;  %v723_v62 = vsub.f32 %v2530_v58, %v3483_v44 }
  0x46   : > { %349 = vmatpush.msra.mxu0 %v2459_v18  ;;  %426 = vmatpush.msra.mxu1 %v425_v2  ;;  %v279_v2 = vld [vmem:[#allocation9 + $0xb8] sm:$0xff]  ;;  %v2568_v23 = vsub.f32 %v281_v42, %v2539_v60  ;;  %v277_v42 = vld [vmem:[#allocation9 + $0xa8] sm:$0xff] }
  0x47   : > { %503 = vmatpush.msra.mxu2 %v2476_v39  ;;  %545 = vmatpush.msra.mxu3 %v2459_v18  ;;  %v2575_v37 = vand.u32 4294901760, %v279_v2  ;;  %v2600_v13 = vand.u32 4294901760, %v277_v42 }
  0x48   : > { %351 = vmatpush.msra.mxu0 %v2466_v30  ;;  %432 = vmatpush.msra.mxu1 %v431_v48  ;;  %v278_v48 = vld [vmem:[#allocation9 + $0xb0] sm:$0xff] }
  0x49   : > { %506 = vmatpush.msra.mxu2 %v2489_v49  ;;  %547 = vmatpush.msra.mxu3 %v2466_v30  ;;  %v2588_v30 = vand.u32 4294901760, %v278_v48  ;;  %v2598_v44 = vsub.f32 %v279_v2, %v2575_v37 }
  0x4a   : > { %558 = vmatpush.msrb.mxu0 %v363_v22  ;;  %438 = vmatpush.msra.mxu1 %v437_v61  ;;  %v712_v22 = vand.u32 4294901760, %v711_v6  ;;  %v455_v61 = vand.u32 4294901760, %v454_v59  ;;  %v276_v6 = vld [vmem:[#allocation9 + $0xa0] sm:$0xff]  ;;  %v3485_v59 = vand.u32 4294901760, %v2547_v33 }
  0x4b   : > { %509 = vmatpush.msra.mxu2 %v2496_v55  ;;  %707 = vmatpush.msrb.mxu3 %v706_v47  ;;  %v2610_v2 = vsub.f32 %v278_v48, %v2588_v30  ;;  %v2612_v45 = vand.u32 4294901760, %v276_v6  ;;  %v2624_v48 = vsub.f32 %v277_v42, %v2600_v13 }
  0x4c   : > { %562 = vmatpush.msrb.mxu0 %v3482_v14  ;;  %444 = vmatpush.msra.mxu1 %v443_v34  ;;  %v718_v34 = vand.u32 4294901760, %v717_v0  ;;  %v729_v14 = vsub.f32 %v2547_v33, %v3485_v59  ;;  %v724_v0 = vand.u32 4294901760, %v723_v62 }
  0x4d   : > { %662 = vmatpush.msrb.mxu2 %v2453_v8  ;;  %713 = vmatpush.msrb.mxu3 %v712_v22  ;;  %v3489_v22 = vand.u32 4294901760, %v2568_v23  ;;  %v2637_v42 = vsub.f32 %v276_v6, %v2612_v45 }
  0x4e   : > { %566 = vmatpush.msrb.mxu0 %v3484_v15  ;;  %450 = vmatpush.msra.mxu1 %v449_v32  ;;  %v275_v32 = vld [vmem:[#allocation9 + $0x98] sm:$0xff]  ;;  %v3487_v15 = vand.u32 4294901760, %v2562_v24  ;;  %v730_v62 = vand.u32 4294901760, %v729_v14 }
  0x4f   : > { %664 = vmatpush.msrb.mxu2 %v2468_v31  ;;  %719 = vmatpush.msrb.mxu3 %v718_v34  ;;  %v2626_v47 = vand.u32 4294901760, %v275_v32 }
  0x50   : > { %570 = vmatpush.msrb.mxu0 %v3486_v16  ;;  %456 = vmatpush.msra.mxu1 %v455_v61  ;;  %v735_v59 = vsub.f32 %v2562_v24, %v3487_v15  ;;  %v741_v61 = vsub.f32 %v2568_v23, %v3489_v22  ;;  %v252_v16 = vld [vmem:[%s2321_s11] sm:$0xff]  ;;  %v274_v22 = vld [vmem:[#allocation9 + $0x90] sm:$0xff] }
  0x51   : > { %666 = vmatpush.msrb.mxu2 %v2491_v54  ;;  %725 = vmatpush.msrb.mxu3 %v724_v0  ;;  %v2639_v15 = vand.u32 4294901760, %v252_v16  ;;  %v3493_v0 = vand.u32 4294901760, %v2598_v44  ;;  %v2649_v6 = vand.u32 4294901760, %v274_v22  ;;  %v2652_v14 = vsub.f32 %v275_v32, %v2626_v47 }
  0x52   : > { %574 = vmatpush.msrb.mxu0 %v3488_v19  ;;  %625 = vmatpush.msrb.mxu1 %v2331_v3  ;;  %v3491_v3 = vand.u32 4294901760, %v2581_v36  ;;  %v736_v34 = vand.u32 4294901760, %v735_v59 }
  0x53   : > { %668 = vmatpush.msrb.mxu2 %v2506_v12  ;;  %731 = vmatpush.msrb.mxu3 %v730_v62  ;;  %v753_v59 = vsub.f32 %v2598_v44, %v3493_v0  ;;  %v2663_v0 = vsub.f32 %v252_v16, %v2639_v15  ;;  %v776_v16 = vand.u32 4294901760, %v2652_v14 }
  0x54   : > { %578 = vmatpush.msrb.mxu0 %v3490_v20  ;;  %627 = vmatpush.msrb.mxu1 %v2333_v4  ;;  %v747_v19 = vsub.f32 %v2581_v36, %v3491_v3  ;;  %v742_v4 = vand.u32 4294901760, %v741_v61  ;;  %v273_v20 = vld [vmem:[#allocation9 + $0x88] sm:$0xff]  ;;  %v3495_v61 = vand.u32 4294901760, %v2610_v2  ;;  %v272_v3 = vld [vmem:[#allocation9 + $0x80] sm:$0xff] }
  0x55   : > { %670 = vmatpush.msrb.mxu2 %v2519_v7  ;;  %737 = vmatpush.msrb.mxu3 %v736_v34  ;;  %v2665_v32 = vand.u32 4294901760, %v273_v20 }
  0x56   : > { %582 = vmatpush.msrb.mxu0 %v3492_v21  ;;  %629 = vmatpush.msrb.mxu1 %v2335_v5  ;;  %v748_v5 = vand.u32 4294901760, %v747_v19  ;;  %v759_v62 = vsub.f32 %v2610_v2, %v3495_v61  ;;  %v770_v21 = vand.u32 4294901760, %v2637_v42  ;;  %v3497_v19 = vand.u32 4294901760, %v2624_v48 }
  0x57   : > { %672 = vmatpush.msrb.mxu2 %v2532_v51  ;;  %743 = vmatpush.msrb.mxu3 %v742_v4  ;;  %v3498_v61 = vand.u32 4294901760, %v2424_v52  ;;  %v3499_v52 = vand.u32 4294901760, %v2429_v53 }
  0x58   : > { %586 = vmatpush.msrb.mxu0 %v3494_v29  ;;  %631 = vmatpush.msrb.mxu1 %v2337_v9  ;;  %v754_v9 = vand.u32 4294901760, %v753_v59  ;;  %v765_v34 = vsub.f32 %v2624_v48, %v3497_v19  ;;  %v2676_v29 = vsub.f32 %v274_v22, %v2649_v6  ;;  %v760_v46 = vand.u32 4294901760, %v759_v62 }
  0x59   : > { %674 = vmatpush.msrb.mxu2 %v2539_v60  ;;  %749 = vmatpush.msrb.mxu3 %v748_v5  ;;  %v771_v4 = vsub.f32 %v2637_v42, %v770_v21  ;;  %v354_v59 = vand.u32 4294901760, %v2663_v0  ;;  %v2689_v22 = vsub.f32 %v273_v20, %v2665_v32  ;;  %v777_v62 = vsub.f32 %v2652_v14, %v776_v16 }
  0x5a   : > { %590 = vmatpush.msrb.mxu0 %v3496_v40  ;;  %633 = vmatpush.msrb.mxu1 %v2339_v10  ;;  %v2681_v10 = vand.u32 4294901760, %v272_v3  ;;  %v766_v5 = vand.u32 4294901760, %v765_v34  ;;  %v782_v40 = vand.u32 4294901760, %v2676_v29  ;;  %v3500_v19 = vand.u32 4294901760, %v2448_v1 }
  0x5b   : > { %676 = vmatpush.msrb.mxu2 %v2554_v27  ;;  %755 = vmatpush.msrb.mxu3 %v754_v9  ;;  %v355_v20 = vsub.f32 %v2663_v0, %v354_v59  ;;  %v788_v9 = vand.u32 4294901760, %v2689_v22 }
  0x5c   : > { %594 = vmatpush.msrb.mxu0 %v3498_v61  ;;  %635 = vmatpush.msrb.mxu1 %v2341_v11  ;;  %v253_v11 = vld [vmem:[%s2321_s11 + $0x8] sm:$0xff]  ;;  %v2704_v53 = vsub.f32 %v272_v3, %v2681_v10  ;;  %v3501_v61 = vand.u32 4294901760, %v2462_v26  ;;  %v783_v1 = vsub.f32 %v2676_v29, %v782_v40  ;;  %v3502_v3 = vand.u32 4294901760, %v2476_v39 }
  0x5d   : > { %678 = vmatpush.msrb.mxu2 %v2575_v37  ;;  %761 = vmatpush.msrb.mxu3 %v760_v46  ;;  %v2709_v34 = vand.u32 4294901760, %v253_v11  ;;  %v356_v26 = vand.u32 4294901760, %v355_v20  ;;  %v3504_v39 = vand.u32 4294901760, %v2496_v55  ;;  %v294_v20 = vld [vmem:[#allocation9 + $0x130] sm:$0xff] }
  0x5e   : > { %598 = vmatpush.msrb.mxu0 %v3499_v52  ;;  %637 = vmatpush.msrb.mxu1 %v2354_v17  ;;  %v772_v17 = vand.u32 4294901760, %v771_v4  ;;  %v794_v46 = vand.u32 4294901760, %v2704_v53  ;;  %v3503_v52 = vand.u32 4294901760, %v2489_v49 }
  0x5f   : > { %680 = vmatpush.msrb.mxu2 %v2588_v30  ;;  %767 = vmatpush.msrb.mxu3 %v766_v5  ;;  %v2727_v4 = vsub.f32 %v253_v11, %v2709_v34 }
  0x60   : > { %602 = vmatpush.msrb.mxu0 %v3500_v19  ;;  %639 = vmatpush.msrb.mxu1 %v2370_v25  ;;  %v778_v25 = vand.u32 4294901760, %v777_v62  ;;  %v795_v5 = vsub.f32 %v2704_v53, %v794_v46  ;;  %v295_v62 = vld [vmem:[#allocation9 + $0x138] sm:$0xff] }
  0x61   : > { %682 = vmatpush.msrb.mxu2 %v2600_v13  ;;  %773 = vmatpush.msrb.mxu3 %v772_v17  ;;  %v695_v11 = vand.u32 4294901760, %v2727_v4 }
  0x62   : > { %606 = vmatpush.msrb.mxu0 %v3501_v61  ;;  %641 = vmatpush.msrb.mxu1 %v2374_v28  ;;  %v789_v28 = vsub.f32 %v2689_v22, %v788_v9 }
  0x63   : > { %684 = vmatpush.msrb.mxu2 %v2612_v45  ;;  %779 = vmatpush.msrb.mxu3 %v778_v25  ;;  %v2889_v25 = vand.u32 4294901760, %v295_v62 }
  0x64   : > { %610 = vmatpush.msrb.mxu0 %v3502_v3  ;;  %643 = vmatpush.msrb.mxu1 %v2392_v35  ;;  %v784_v35 = vand.u32 4294901760, %v783_v1  ;;  %v790_v49 = vand.u32 4294901760, %v789_v28  ;;  %v293_v3 = vld [vmem:[#allocation9 + $0x128] sm:$0xff] }
  0x65   : > { %686 = vmatpush.msrb.mxu2 %v2626_v47  ;;  %357 = vmatmul.f32.vlgmr.msra.gmra.mxu0 %v356_v26  ;;  %v2902_v26 = vand.u32 4294901760, %v294_v20 }
  0x66   : > { %614 = vmatpush.msrb.mxu0 %v3503_v52  ;;  %645 = vmatpush.msrb.mxu1 %v2404_v41  ;;  %v796_v41 = vand.u32 4294901760, %v795_v5  ;;  %v292_v52 = vld [vmem:[#allocation9 + $0x120] sm:$0xff] }
  0x67   : > { %688 = vmatpush.msrb.mxu2 %v2649_v6  ;;  %785 = vmatpush.msrb.mxu3 %v784_v35 }
  0x68   : > { %618 = vmatpush.msrb.mxu0 %v3504_v39  ;;  %647 = vmatpush.msrb.mxu1 %v2420_v50  ;;  %v696_v50 = vsub.f32 %v2727_v4, %v695_v11  ;;  %v2914_v39 = vand.u32 4294901760, %v293_v3 }
  0x69   : > { %690 = vmatpush.msrb.mxu2 %v2665_v32  ;;  %791 = vmatpush.msrb.mxu3 %v790_v49  ;;  %v2918_v49 = vsub.f32 %v295_v62, %v2889_v25 }
  0x6a   : > { %805 = vmatpush.msra.mxu0 %v2484_v43  ;;  %649 = vmatpush.msrb.mxu1 %v2435_v57  ;;  %v3505_v57 = vand.u32 4294901760, %v2484_v43  ;;  %v697_v55 = vand.u32 4294901760, %v696_v50  ;;  %v3508_v43 = vand.u32 4294901760, %v2517_v38 }
  0x6b   : > { %512 = vmatmul.f32.vlgmr.msra.gmra.mxu2 %v2663_v0  ;;  %551 = vmatmul.f32.vlgmr.msra.gmra.mxu3 %v354_v59  ;;  %v3507_v0 = vld [vmem:[#allocation15_spill] sm:$0xff] }
  0x6c   : > { %808 = vmatpush.msra.mxu0 %v2499_v56  ;;  %651 = vmatpush.msrb.mxu1 %v2444_v63  ;;  %v3506_v63 = vand.u32 4294901760, %v2499_v56  ;;  %v3516_v56 = vand.u32 4294901760, %v2624_v48 }
  0x6d   : > { %692 = vmatpush.msrb.mxu2 %v2681_v10  ;;  %797 = vmatpush.msrb.mxu3 %v796_v41  ;;  %v291_v41 = vld [vmem:[#allocation9 + $0x118] sm:$0xff] }
  0x6e   : > { %811 = vmatpush.msra.mxu0 %v2517_v38  ;;  %653 = vmatpush.msrb.mxu1 %v2459_v18  ;;  %v3509_v18 = vand.u32 4294901760, %v2530_v58 }
  0x6f   : > { %899 = vmatpush.msra.mxu2 %v3505_v57  ;;  %458 = vmatmul.f32.vlgmr.msra.gmra.mxu1 %v2639_v15  ;;  %v2927_v57 = vand.u32 4294901760, %v292_v52 }
  0x70   : > { %814 = vmatpush.msra.mxu0 %v2530_v58  ;;  %966 = vmatpush.msra.mxu3 %v2453_v8  ;;  %v3511_v58 = vand.u32 4294901760, %v2562_v24 }
  0x71   : > { %903 = vmatpush.msra.mxu2 %v3506_v63  ;;  %655 = vmatpush.msrb.mxu1 %v3507_v0 }
  0x72   : > { %817 = vmatpush.msra.mxu0 %v2547_v33  ;;  %968 = vmatpush.msra.mxu3 %v2468_v31 }
  0x73   : > { %858 = vmatpush.msra.mxu1 %v2453_v8  ;;  %907 = vmatpush.msra.mxu2 %v3508_v43  ;;  %v3510_v8 = vand.u32 4294901760, %v2547_v33  ;;  %v3512_v33 = vand.u32 4294901760, %v2568_v23  ;;  %v290_v43 = vld [vmem:[#allocation9 + $0x110] sm:$0xff] }
  0x74   : > { %698 = vmatmul.f32.vlgmr.msrb.gmra.mxu2 %v697_v55  ;;  %820 = vmatpush.msra.mxu0 %v2562_v24  ;;  %v303_v24 = vld [vmem:[#allocation9 + $0x178] sm:$0xff]  ;;  %v2931_v55 = vsub.f32 %v294_v20, %v2902_v26 }
  0x75   : > { %860 = vmatpush.msra.mxu1 %v2468_v31  ;;  %911 = vmatpush.msra.mxu2 %v3509_v18  ;;  %v3513_v31 = vand.u32 4294901760, %v2581_v36  ;;  %v2803_v38 = vand.u32 4294901760, %v303_v24 }
  0x76   : > { %970 = vmatpush.msra.mxu3 %v2491_v54  ;;  %620 = vmatmul.f32.vlgmr.msrb.gmra.mxu0 %v2639_v15 }
  0x77   : > { %799 = vmatmul.f32.vlgmr.msrb.gmra.mxu3 %v2709_v34  ;;  %823 = vmatpush.msra.mxu0 %v2568_v23  ;;  %v302_v23 = vld [vmem:[#allocation9 + $0x170] sm:$0xff] }
  0x78   : > { %862 = vmatpush.msra.mxu1 %v2491_v54  ;;  %915 = vmatpush.msra.mxu2 %v3510_v8  ;;  %v301_v54 = vld [vmem:[#allocation9 + $0x168] sm:$0xff] }
  0x79   : > { %972 = vmatpush.msra.mxu3 %v2506_v12  ;;  %657 = vmatmul.f32.vlgmr.msrb.gmra.mxu1 %v2639_v15 }
  0x7a   : > { %826 = vmatpush.msra.mxu0 %v2581_v36  ;;  %864 = vmatpush.msra.mxu1 %v2506_v12  ;;  %v2810_v12 = vand.u32 4294901760, %v302_v23  ;;  %v299_v36 = vld [vmem:[#allocation9 + $0x158] sm:$0xff] }
  0x7b   : > { %919 = vmatpush.msra.mxu2 %v3511_v58  ;;  %974 = vmatpush.msra.mxu3 %v2519_v7  ;;  %v2834_v15 = vand.u32 4294901760, %v299_v36  ;;  %v2941_v58 = vand.u32 4294901760, %v291_v41 }
  0x7c   : > { %829 = vmatpush.msra.mxu0 %v2598_v44  ;;  %866 = vmatpush.msra.mxu1 %v2519_v7  ;;  %v3514_v7 = vand.u32 4294901760, %v2598_v44  ;;  %v2830_v44 = vsub.f32 %v302_v23, %v2810_v12  ;;  %v2953_v23 = vand.u32 4294901760, %v290_v43 }
  0x7d   : > { %923 = vmatpush.msra.mxu2 %v3512_v33  ;;  %976 = vmatpush.msra.mxu3 %v2532_v51  ;;  %v3458_v33 = vand.u32 4294901760, %v2918_v49 }
  0x7e   : > { %832 = vmatpush.msra.mxu0 %v2610_v2  ;;  %868 = vmatpush.msra.mxu1 %v2532_v51  ;;  %v3515_v51 = vand.u32 4294901760, %v2610_v2  ;;  %v298_v2 = vld [vmem:[#allocation9 + $0x150] sm:$0xff] }
  0x7f   : > { %927 = vmatpush.msra.mxu2 %v3513_v31  ;;  %978 = vmatpush.msra.mxu3 %v2539_v60  ;;  %v2945_v31 = vsub.f32 %v293_v3, %v2914_v39  ;;  %v2982_v3 = vsub.f32 %v290_v43, %v2953_v23 }
  0x80   : > { %835 = vmatpush.msra.mxu0 %v2624_v48  ;;  %870 = vmatpush.msra.mxu1 %v2539_v60  ;;  %v2817_v60 = vand.u32 4294901760, %v301_v54 }
  0x81   : > { %931 = vmatpush.msra.mxu2 %v3514_v7  ;;  %980 = vmatpush.msra.mxu3 %v2554_v27 }
  0x82   : > { %838 = vmatpush.msra.mxu0 %v2637_v42  ;;  %872 = vmatpush.msra.mxu1 %v2554_v27  ;;  %v300_v27 = vld [vmem:[#allocation9 + $0x160] sm:$0xff]  ;;  %v2841_v48 = vsub.f32 %v301_v54, %v2817_v60  ;;  %v297_v42 = vld [vmem:[#allocation9 + $0x148] sm:$0xff]  ;;  %v2957_v54 = vsub.f32 %v292_v52, %v2927_v57 }
  0x83   : > { %935 = vmatpush.msra.mxu2 %v3515_v51  ;;  %982 = vmatpush.msra.mxu3 %v2575_v37  ;;  %v2865_v59 = vand.u32 4294901760, %v297_v42  ;;  %v3457_v51 = vand.u32 4294901760, %v2931_v55 }
  0x84   : > { %841 = vmatpush.msra.mxu0 %v2652_v14  ;;  %874 = vmatpush.msra.mxu1 %v2575_v37  ;;  %v2820_v37 = vsub.f32 %v303_v24, %v2803_v38  ;;  %v2845_v14 = vand.u32 4294901760, %v298_v2 }
  0x85   : > { %939 = vmatpush.msra.mxu2 %v3516_v56  ;;  %984 = vmatpush.msra.mxu3 %v2588_v30  ;;  %v2892_v1 = vsub.f32 %v297_v42, %v2865_v59  ;;  %v289_v56 = vld [vmem:[#allocation9 + $0x108] sm:$0xff]  ;;  %v3455_v42 = vand.u32 4294901760, %v2945_v31 }
  0x86   : > { %844 = vmatpush.msra.mxu0 %v2676_v29  ;;  %876 = vmatpush.msra.mxu1 %v2588_v30  ;;  %v2827_v30 = vand.u32 4294901760, %v300_v27  ;;  %v2974_v62 = vand.u32 4294901760, %v289_v56 }
  0x87   : > { %943 = vmatpush.msra.mxu2 %v770_v21  ;;  %986 = vmatpush.msra.mxu3 %v2600_v13  ;;  %v3460_v5 = vand.u32 4294901760, %v2892_v1 }
  0x88   : > { %847 = vmatpush.msra.mxu0 %v2689_v22  ;;  %878 = vmatpush.msra.mxu1 %v2600_v13  ;;  %v1045_v13 = vand.u32 4294901760, %v2820_v37  ;;  %v2852_v21 = vsub.f32 %v300_v27, %v2827_v30  ;;  %v1057_v22 = vand.u32 4294901760, %v2841_v48 }
  0x89   : > { %947 = vmatpush.msra.mxu2 %v776_v16  ;;  %988 = vmatpush.msra.mxu3 %v2612_v45  ;;  %v2857_v16 = vsub.f32 %v299_v36, %v2834_v15  ;;  %v1082_v8 = vsub.f32 %v2892_v1, %v3460_v5 }
  0x8a   : > { %850 = vmatpush.msra.mxu0 %v2704_v53  ;;  %880 = vmatpush.msra.mxu1 %v2612_v45  ;;  %v1051_v45 = vand.u32 4294901760, %v2830_v44  ;;  %v1046_v29 = vsub.f32 %v2820_v37, %v1045_v13  ;;  %v3466_v53 = vand.u32 4294901760, %v2852_v21  ;;  %v1058_v61 = vsub.f32 %v2841_v48, %v1057_v22 }
  0x8b   : > { %951 = vmatpush.msra.mxu2 %v782_v40  ;;  %990 = vmatpush.msra.mxu3 %v2626_v47  ;;  %v3463_v17 = vand.u32 4294901760, %v2857_v16  ;;  %v1083_v36 = vand.u32 4294901760, %v1082_v8  ;;  %v3461_v8 = vand.u32 4294901760, %v2982_v3 }
  0x8c   : > { %853 = vmatmul.f32.vlgmr.msra.gmra.mxu0 %v2727_v4  ;;  %882 = vmatpush.msra.mxu1 %v2626_v47  ;;  %v296_v47 = vld [vmem:[#allocation9 + $0x140] sm:$0xff]  ;;  %v1052_v40 = vsub.f32 %v2830_v44, %v1051_v45  ;;  %v1059_v35 = vand.u32 4294901760, %v1058_v61  ;;  %v254_v4 = vld [vmem:[%s2321_s11 + $0x10] sm:$0xff]  ;;  %v3454_v61 = vand.u32 4294901760, %v2957_v54 }
  0x8d   : > { %1003 = vmatpush.msrb.mxu0 %v2803_v38  ;;  %955 = vmatpush.msra.mxu2 %v788_v9  ;;  %v2878_v19 = vand.u32 4294901760, %v296_v47  ;;  %v1047_v9 = vand.u32 4294901760, %v1046_v29  ;;  %v2935_v18 = vand.u32 4294901760, %v254_v4  ;;  %v319_v29 = vld [vmem:[#allocation9 + $0x1f8] sm:$0xff] }
  0x8e   : > { %992 = vmatpush.msra.mxu3 %v2649_v6  ;;  %884 = vmatpush.msra.mxu1 %v2649_v6  ;;  %v2871_v6 = vsub.f32 %v298_v2, %v2845_v14  ;;  %v1094_v2 = vsub.f32 %v2918_v49, %v3458_v33  ;;  %v1112_v43 = vsub.f32 %v2957_v54, %v3454_v61 }
  0x8f   : > { %1005 = vmatpush.msrb.mxu0 %v2810_v12  ;;  %959 = vmatpush.msra.mxu2 %v794_v46  ;;  %v1064_v46 = vsub.f32 %v2852_v21, %v3466_v53  ;;  %v2905_v28 = vsub.f32 %v296_v47, %v2878_v19  ;;  %v2962_v27 = vsub.f32 %v254_v4, %v2935_v18  ;;  %v311_v53 = vld [vmem:[#allocation9 + $0x1b8] sm:$0xff] }
  0x90   : > { %994 = vmatpush.msra.mxu3 %v2665_v32  ;;  %961 = vmatmul.f32.vlgmr.msra.gmra.mxu2 %v2709_v34  ;;  %v2970_v47 = vsub.f32 %v291_v41, %v2941_v58  ;;  %v1095_v52 = vand.u32 4294901760, %v1094_v2  ;;  %v2999_v41 = vsub.f32 %v289_v56, %v2974_v62 }
  0x91   : > { %1007 = vmatpush.msrb.mxu0 %v2817_v60  ;;  %1146 = vmatpush.msrb.mxu2 %v2820_v37  ;;  %v1065_v50 = vand.u32 4294901760, %v1064_v46  ;;  %v3459_v63 = vand.u32 4294901760, %v2905_v28  ;;  %v2987_v46 = vand.u32 4294901760, %v319_v29 }
  0x92   : > { %886 = vmatpush.msra.mxu1 %v2665_v32  ;;  %996 = vmatpush.msra.mxu3 %v2681_v10  ;;  %v3462_v32 = vand.u32 4294901760, %v2871_v6 }
  0x93   : > { %998 = vmatmul.f32.vlgmr.msra.gmra.mxu3 %v2709_v34  ;;  %1009 = vmatpush.msrb.mxu0 %v2827_v30  ;;  %v1053_v34 = vand.u32 4294901760, %v1052_v40  ;;  %v1088_v7 = vsub.f32 %v2905_v28, %v3459_v63  ;;  %v288_v40 = vld [vmem:[#allocation9 + $0x100] sm:$0xff] }
  0x94   : > { %1149 = vmatpush.msrb.mxu2 %v2830_v44  ;;  %1199 = vmatpush.msrb.mxu3 %v2803_v38  ;;  %v2993_v4 = vand.u32 4294901760, %v288_v40 }
  0x95   : > { %888 = vmatpush.msra.mxu1 %v2681_v10  ;;  %1011 = vmatpush.msrb.mxu0 %v2834_v15  ;;  %v1070_v10 = vsub.f32 %v2857_v16, %v3463_v17  ;;  %v1089_v20 = vand.u32 4294901760, %v1088_v7  ;;  %v316_v7 = vld [vmem:[#allocation9 + $0x1e0] sm:$0xff] }
  0x96   : > { %892 = vmatmul.f32.vlgmr.msra.gmra.mxu1 %v695_v11  ;;  %1152 = vmatpush.msrb.mxu2 %v2841_v48  ;;  %v1076_v11 = vsub.f32 %v2871_v6, %v3462_v32 }
  0x97   : > { %1048 = vmatpush.msrb.mxu1 %v1047_v9  ;;  %1201 = vmatpush.msrb.mxu3 %v2810_v12  ;;  %v1071_v0 = vand.u32 4294901760, %v1070_v10  ;;  %v1100_v9 = vsub.f32 %v2931_v55, %v3457_v51  ;;  %v318_v10 = vld [vmem:[#allocation9 + $0x1f0] sm:$0xff] }
  0x98   : > { %1013 = vmatpush.msrb.mxu0 %v2845_v14  ;;  %1155 = vmatpush.msrb.mxu2 %v2852_v21  ;;  %v1077_v24 = vand.u32 4294901760, %v1076_v11  ;;  %v3456_v11 = vand.u32 4294901760, %v2970_v47 }
  0x99   : > { %1054 = vmatpush.msrb.mxu1 %v1053_v34  ;;  %1203 = vmatpush.msrb.mxu3 %v2817_v60  ;;  %v3468_v34 = vand.u32 4294901760, %v2962_v27 }
  0x9a   : > { %1015 = vmatpush.msrb.mxu0 %v2865_v59  ;;  %1158 = vmatpush.msrb.mxu2 %v2857_v16 }
  0x9b   : > { %1060 = vmatpush.msrb.mxu1 %v1059_v35  ;;  %1205 = vmatpush.msrb.mxu3 %v2827_v30  ;;  %v1106_v35 = vsub.f32 %v2945_v31, %v3455_v42  ;;  %v1037_v56 = vsub.f32 %v2962_v27, %v3468_v34  ;;  %v315_v42 = vld [vmem:[#allocation9 + $0x1d8] sm:$0xff]  ;;  %v310_v34 = vld [vmem:[#allocation9 + $0x1b0] sm:$0xff] }
  0x9c   : > { %1017 = vmatpush.msrb.mxu0 %v2878_v19  ;;  %1161 = vmatpush.msrb.mxu2 %v2871_v6  ;;  %v3040_v63 = vand.u32 4294901760, %v315_v42 }
  0x9d   : > { %1066 = vmatpush.msrb.mxu1 %v1065_v50  ;;  %1207 = vmatpush.msrb.mxu3 %v2834_v15  ;;  %v317_v50 = vld [vmem:[#allocation9 + $0x1e8] sm:$0xff]  ;;  %v1107_v2 = vand.u32 4294901760, %v1106_v35  ;;  %v1113_v35 = vand.u32 4294901760, %v1112_v43  ;;  %v1038_v51 = vand.u32 4294901760, %v1037_v56 }
  0x9e   : > { %1019 = vmatpush.msrb.mxu0 %v2889_v25  ;;  %1164 = vmatpush.msrb.mxu2 %v2892_v1  ;;  %v3023_v61 = vand.u32 4294901760, %v317_v50 }
  0x9f   : > { %1072 = vmatpush.msrb.mxu1 %v1071_v0  ;;  %1209 = vmatpush.msrb.mxu3 %v2845_v14  ;;  %v1101_v0 = vand.u32 4294901760, %v1100_v9  ;;  %v3021_v9 = vsub.f32 %v288_v40, %v2993_v4  ;;  %v1124_v40 = vsub.f32 %v2982_v3, %v3461_v8 }
  0xa0   : > { %1021 = vmatpush.msrb.mxu0 %v2902_v26  ;;  %1167 = vmatpush.msrb.mxu2 %v2905_v28  ;;  %v3045_v8 = vsub.f32 %v317_v50, %v3023_v61 }
  0xa1   : > { %1078 = vmatpush.msrb.mxu1 %v1077_v24  ;;  %1211 = vmatpush.msrb.mxu3 %v2865_v59  ;;  %v3006_v24 = vand.u32 4294901760, %v318_v10  ;;  %v3467_v5 = vand.u32 4294901760, %v3021_v9 }
  0xa2   : > { %1023 = vmatpush.msrb.mxu0 %v2914_v39  ;;  %1170 = vmatpush.msrb.mxu2 %v2918_v49 }
  0xa3   : > { %1084 = vmatpush.msrb.mxu1 %v1083_v36  ;;  %1213 = vmatpush.msrb.mxu3 %v2878_v19  ;;  %v3014_v36 = vsub.f32 %v319_v29, %v2987_v46  ;;  %v3464_v29 = vand.u32 4294901760, %v2999_v41 }
  0xa4   : > { %1025 = vmatpush.msrb.mxu0 %v2927_v57  ;;  %1173 = vmatpush.msrb.mxu2 %v2931_v55 }
  0xa5   : > { %1090 = vmatpush.msrb.mxu1 %v1089_v20  ;;  %1215 = vmatpush.msrb.mxu3 %v2889_v25  ;;  %v1118_v20 = vsub.f32 %v2970_v47, %v3456_v11  ;;  %v3035_v11 = vsub.f32 %v318_v10, %v3006_v24  ;;  %v3465_v33 = vand.u32 4294901760, %v3014_v36  ;;  %v1130_v10 = vsub.f32 %v2999_v41, %v3464_v29 }
  0xa6   : > { %1027 = vmatpush.msrb.mxu0 %v2941_v58  ;;  %1176 = vmatpush.msrb.mxu2 %v2945_v31  ;;  %v3064_v29 = vsub.f32 %v315_v42, %v3040_v63 }
  0xa7   : > { %1096 = vmatpush.msrb.mxu1 %v1095_v52  ;;  %1217 = vmatpush.msrb.mxu3 %v2902_v26  ;;  %v3028_v52 = vand.u32 4294901760, %v316_v7  ;;  %v1119_v43 = vand.u32 4294901760, %v1118_v20  ;;  %v1125_v20 = vand.u32 4294901760, %v1124_v40  ;;  %v3470_v32 = vand.u32 4294901760, %v3035_v11 }
  0xa8   : > { %1029 = vmatpush.msrb.mxu0 %v2953_v23  ;;  %1179 = vmatpush.msrb.mxu2 %v2957_v54  ;;  %v1387_v17 = vsub.f32 %v3014_v36, %v3465_v33  ;;  %v1131_v33 = vand.u32 4294901760, %v1130_v10 }
  0xa9   : > { %1102 = vmatpush.msrb.mxu1 %v1101_v0  ;;  %1219 = vmatpush.msrb.mxu3 %v2914_v39  ;;  %v314_v0 = vld [vmem:[#allocation9 + $0x1d0] sm:$0xff]  ;;  %v3053_v56 = vsub.f32 %v316_v7, %v3028_v52  ;;  %v312_v7 = vld [vmem:[#allocation9 + $0x1c0] sm:$0xff]  ;;  %v1393_v37 = vsub.f32 %v3035_v11, %v3470_v32 }
  0xaa   : > { %1031 = vmatpush.msrb.mxu0 %v2974_v62  ;;  %1182 = vmatpush.msrb.mxu2 %v2970_v47  ;;  %v3057_v50 = vand.u32 4294901760, %v314_v0  ;;  %v1388_v10 = vand.u32 4294901760, %v1387_v17  ;;  %v3517_v17 = vand.u32 4294901760, %v2962_v27 }
  0xab   : > { %1108 = vmatpush.msrb.mxu1 %v1107_v2  ;;  %1221 = vmatpush.msrb.mxu3 %v2927_v57  ;;  %v313_v2 = vld [vmem:[#allocation9 + $0x1c8] sm:$0xff]  ;;  %v3471_v42 = vand.u32 4294901760, %v3053_v56 }
  0xac   : > { %1033 = vmatpush.msrb.mxu0 %v2993_v4  ;;  %1185 = vmatpush.msrb.mxu2 %v2982_v3  ;;  %v3072_v40 = vand.u32 4294901760, %v313_v2 }
  0xad   : > { %1114 = vmatpush.msrb.mxu1 %v1113_v35  ;;  %1223 = vmatpush.msrb.mxu3 %v2941_v58  ;;  %v1136_v35 = vsub.f32 %v3021_v9, %v3467_v5  ;;  %v3472_v5 = vand.u32 4294901760, %v3064_v29  ;;  %v1405_v48 = vsub.f32 %v3053_v56, %v3471_v42 }
  0xae   : > { %1039 = vmatmul.f32.vlgmr.msrb.gmra.mxu0 %v1038_v51  ;;  %1188 = vmatpush.msrb.mxu2 %v2999_v41  ;;  %v3469_v51 = vand.u32 4294901760, %v3045_v8 }
  0xaf   : > { %1240 = vmatpush.msra.mxu0 %v1045_v13  ;;  %1120 = vmatpush.msrb.mxu1 %v1119_v43  ;;  %v3083_v13 = vsub.f32 %v314_v0, %v3057_v50  ;;  %v3085_v43 = vand.u32 4294901760, %v312_v7  ;;  %v1137_v44 = vand.u32 4294901760, %v1136_v35  ;;  %v3097_v0 = vsub.f32 %v313_v2, %v3072_v40  ;;  %v307_v2 = vld [vmem:[#allocation9 + $0x198] sm:$0xff] }
  0xb0   : > { %1225 = vmatpush.msrb.mxu3 %v2953_v23  ;;  %1191 = vmatpush.msrb.mxu2 %v3021_v9  ;;  %v3518_v35 = vand.u32 4294901760, %v2852_v21  ;;  %v1411_v42 = vsub.f32 %v3064_v29, %v3472_v5  ;;  %v3519_v21 = vand.u32 4294901760, %v2857_v16  ;;  %v3521_v5 = vand.u32 4294901760, %v2871_v6  ;;  %v306_v6 = vld [vmem:[#allocation9 + $0x190] sm:$0xff] }
  0xb1   : > { %1244 = vmatpush.msra.mxu0 %v1051_v45  ;;  %1126 = vmatpush.msrb.mxu1 %v1125_v20  ;;  %v1399_v45 = vsub.f32 %v3045_v8, %v3469_v51  ;;  %v3099_v20 = vand.u32 4294901760, %v311_v53  ;;  %v1394_v51 = vand.u32 4294901760, %v1393_v37  ;;  %v3111_v32 = vsub.f32 %v312_v7, %v3085_v43 }
  0xb2   : > { %1227 = vmatpush.msrb.mxu3 %v2974_v62  ;;  %1194 = vmatmul.f32.vlgmr.msrb.gmra.mxu2 %v2962_v27  ;;  %v308_v27 = vld [vmem:[#allocation9 + $0x1a0] sm:$0xff]  ;;  %v3520_v16 = vand.u32 4294901760, %v3083_v13 }
  0xb3   : > { %1248 = vmatpush.msra.mxu0 %v1057_v22  ;;  %1344 = vmatpush.msra.mxu2 %v2987_v46  ;;  %v309_v22 = vld [vmem:[#allocation9 + $0x1a8] sm:$0xff]  ;;  %v1400_v37 = vand.u32 4294901760, %v1399_v45  ;;  %v3123_v7 = vsub.f32 %v311_v53, %v3099_v20  ;;  %v3474_v45 = vand.u32 4294901760, %v3111_v32 }
  0xb4   : > { %1132 = vmatpush.msrb.mxu1 %v1131_v33  ;;  %1229 = vmatpush.msrb.mxu3 %v2993_v4  ;;  %v3113_v33 = vand.u32 4294901760, %v310_v34 }
  0xb5   : > { %1233 = vmatmul.f32.vlgmr.msrb.gmra.mxu3 %v3517_v17  ;;  %1252 = vmatpush.msra.mxu0 %v3518_v35  ;;  %v3473_v17 = vand.u32 4294901760, %v3097_v0  ;;  %v3125_v35 = vand.u32 4294901760, %v309_v22 }
  0xb6   : > { %1346 = vmatpush.msra.mxu2 %v3006_v24  ;;  %1389 = vmatpush.msra.mxu3 %v1388_v10  ;;  %v1406_v10 = vand.u32 4294901760, %v1405_v48  ;;  %v3135_v53 = vsub.f32 %v310_v34, %v3113_v33  ;;  %v1412_v48 = vand.u32 4294901760, %v1411_v42  ;;  %v1429_v42 = vsub.f32 %v3111_v32, %v3474_v45 }
  0xb7   : > { %1138 = vmatpush.msrb.mxu1 %v1137_v44  ;;  %1256 = vmatpush.msra.mxu0 %v3519_v21  ;;  %v1417_v44 = vsub.f32 %v3083_v13, %v3520_v16  ;;  %v3137_v21 = vand.u32 4294901760, %v308_v27  ;;  %v3148_v34 = vsub.f32 %v309_v22, %v3125_v35  ;;  %v3150_v16 = vand.u32 4294901760, %v307_v2 }
  0xb8   : > { %1140 = vmatmul.f32.vlgmr.msrb.gmra.mxu1 %v2935_v18  ;;  %1348 = vmatpush.msra.mxu2 %v3023_v61 }
  0xb9   : > { %1307 = vmatpush.msra.mxu1 %v2803_v38  ;;  %1395 = vmatpush.msra.mxu3 %v1394_v51  ;;  %v1423_v38 = vsub.f32 %v3097_v0, %v3473_v17  ;;  %v3161_v22 = vsub.f32 %v308_v27, %v3137_v21  ;;  %v305_v17 = vld [vmem:[#allocation9 + $0x188] sm:$0xff]  ;;  %v255_v51 = vld [vmem:[%s2321_s11 + $0x18] sm:$0xff]  ;;  %v3175_v45 = vsub.f32 %v307_v2, %v3150_v16  ;;  %v3527_v27 = vand.u32 4294901760, %v2931_v55  ;;  %s2124_s11 = sshra.s32 %s1836_s30, 4  ;;  %s2125_s11 = int_to_ptr.hbm [resolvable:$true] %s2124_s11 }
  0xba   : > { %1260 = vmatpush.msra.mxu0 %v3521_v5  ;;  %1350 = vmatpush.msra.mxu2 %v3028_v52  ;;  %v3522_v5 = vand.u32 4294901760, %v2892_v1  ;;  %v3523_v1 = vand.u32 4294901760, %v2905_v28  ;;  %v3525_v28 = vand.u32 4294901760, %v2918_v49  ;;  %v3529_v55 = vand.u32 4294901760, %v2945_v31  ;;  %s2126_s19 = scalar_lea.hbm %s2125_s11, 8  ;;  %p2131_p11 = scmp.lt.s32.totalorder %s2125_s11, %s3434_s3 }
  0xbb   : > { %1309 = vmatpush.msra.mxu1 %v2810_v12  ;;  %1401 = vmatpush.msra.mxu3 %v1400_v37  ;;  %v1418_v12 = vand.u32 4294901760, %v1417_v44  ;;  %v304_v37 = vld [vmem:[#allocation9 + $0x180] sm:$0xff]  ;;  %v1452_v2 = vand.u32 4294901760, %v3161_v22  ;;  %p2127_p3 = scmp.ne.s32.totalorder %s2125_s11, %s2126_s19  ;;  %p2132_p12 = scmp.lt.s32.totalorder %s2130_s5, %s2126_s19 }
  0xbc   : > { %1264 = vmatpush.msra.mxu0 %v3522_v5  ;;  %1352 = vmatpush.msra.mxu2 %v3040_v63  ;;  %v3167_v5 = vand.u32 4294901760, %v306_v6 }
  0xbd   : > { %1311 = vmatpush.msra.mxu1 %v2817_v60  ;;  %1407 = vmatpush.msra.mxu3 %v1406_v10  ;;  %v1424_v60 = vand.u32 4294901760, %v1423_v38  ;;  %v3524_v10 = vand.u32 4294901760, %v3123_v7  ;;  %v3526_v38 = vand.u32 4294901760, %v3135_v53  ;;  %p2128_p9 = pnand %p2127_p3, %p2295_p4  ;;  %p2133_p13 = por %p2132_p12, %p2131_p11 }
  0xbe   : > { %1268 = vmatpush.msra.mxu0 %v3523_v1  ;;  %1354 = vmatpush.msra.mxu2 %v3057_v50  ;;  %v3180_v1 = vand.u32 4294901760, %v305_v17  ;;  %v3193_v49 = vsub.f32 %v306_v6, %v3167_v5 }
  0xbf   : > { %1313 = vmatpush.msra.mxu1 %v2827_v30  ;;  %1413 = vmatpush.msra.mxu3 %v1412_v48  ;;  %v1435_v44 = vsub.f32 %v3123_v7, %v3524_v10  ;;  %v3182_v30 = vand.u32 4294901760, %v255_v51  ;;  %v1430_v48 = vand.u32 4294901760, %v1429_v42  ;;  %v1441_v10 = vsub.f32 %v3135_v53, %v3526_v38  ;;  %p2129_p10 = pneg %p2128_p9 }
  0xc0   : > { %1272 = vmatpush.msra.mxu0 %v3525_v28  ;;  %1356 = vmatpush.msra.mxu2 %v3072_v40  ;;  %v3195_v28 = vand.u32 4294901760, %v304_v37  ;;  %v1458_v38 = vand.u32 4294901760, %v3175_v45  ;;  %v3206_v6 = vsub.f32 %v305_v17, %v3180_v1  ;;  %v1464_v31 = vand.u32 4294901760, %v3193_v49 }
  0xc1   : > { %1315 = vmatpush.msra.mxu1 %v2834_v15  ;;  %1419 = vmatpush.msra.mxu3 %v1418_v12  ;;  %v1436_v15 = vand.u32 4294901760, %v1435_v44  ;;  %v3528_v12 = vand.u32 4294901760, %v3148_v34  ;;  %v3530_v44 = vand.u32 4294901760, %v2957_v54  ;;  %p2134_p0 = pnand %p2133_p13, %p2129_p10 }
  0xc2   : > { %1276 = vmatpush.msra.mxu0 %v3527_v27  ;;  %1358 = vmatpush.msra.mxu2 %v3085_v43  ;;  %v3209_v27 = vsub.f32 %v255_v51, %v3182_v30  ;;  %v3220_v17 = vsub.f32 %v304_v37, %v3195_v28  ;;  %v1459_v51 = vsub.f32 %v3175_v45, %v1458_v38  ;;  %v1470_v54 = vand.u32 4294901760, %v3206_v6 }
  0xc3   : > { %1317 = vmatpush.msra.mxu1 %v2845_v14  ;;  %1425 = vmatpush.msra.mxu3 %v1424_v60  ;;  %v1447_v42 = vsub.f32 %v3148_v34, %v3528_v12  ;;  %v1442_v14 = vand.u32 4294901760, %v1441_v10  ;;  %v1453_v60 = vsub.f32 %v3161_v22, %v1452_v2 }
  0xc4   : > { %1280 = vmatpush.msra.mxu0 %v3529_v55  ;;  %1360 = vmatpush.msra.mxu2 %v3099_v20  ;;  %v1377_v10 = vand.u32 4294901760, %v3209_v27  ;;  %v1460_v12 = vand.u32 4294901760, %v1459_v51 }
  0xc5   : > { %1319 = vmatpush.msra.mxu1 %v2865_v59  ;;  %1431 = vmatpush.msra.mxu3 %v1430_v48  ;;  %v1448_v59 = vand.u32 4294901760, %v1447_v42  ;;  %v3531_v48 = vand.u32 4294901760, %v2970_v47  ;;  %v1454_v37 = vand.u32 4294901760, %v1453_v60  ;;  %v1465_v47 = vsub.f32 %v3193_v49, %v1464_v31 }
  0xc6   : > { %1284 = vmatpush.msra.mxu0 %v3530_v44  ;;  %1362 = vmatpush.msra.mxu2 %v3113_v33  ;;  %v3533_v42 = vand.u32 4294901760, %v2999_v41 }
  0xc7   : > { %1321 = vmatpush.msra.mxu1 %v2878_v19  ;;  %1437 = vmatpush.msra.mxu3 %v1436_v15  ;;  %v3532_v19 = vand.u32 4294901760, %v2982_v3  ;;  %v1476_v15 = vand.u32 4294901760, %v3220_v17  ;;  %v1378_v3 = vsub.f32 %v3209_v27, %v1377_v10  ;;  %v1466_v41 = vand.u32 4294901760, %v1465_v47 }
  0xc8   : > { %1288 = vmatpush.msra.mxu0 %v3531_v48  ;;  %1364 = vmatpush.msra.mxu2 %v3125_v35  ;;  %v1684_v47 = vlaneseq }
  0xc9   : > { %1323 = vmatpush.msra.mxu1 %v2889_v25  ;;  %1443 = vmatpush.msra.mxu3 %v1442_v14  ;;  %v1471_v25 = vsub.f32 %v3206_v6, %v1470_v54  ;;  %v1477_v55 = vsub.f32 %v3220_v17, %v1476_v15 }
  0xca   : > { %1292 = vmatpush.msra.mxu0 %v3532_v19  ;;  %1366 = vmatpush.msra.mxu2 %v3137_v21 }
  0xcb   : > { %1325 = vmatpush.msra.mxu1 %v2902_v26  ;;  %1449 = vmatpush.msra.mxu3 %v1448_v59  ;;  %v3534_v26 = vand.u32 4294901760, %v3021_v9  ;;  %v1472_v14 = vand.u32 4294901760, %v1471_v25  ;;  %v1478_v9 = vand.u32 4294901760, %v1477_v55  ;;  %v3361_v25 = vand.u32 127, %v1684_v47 }
  0xcc   : > { %1296 = vmatpush.msra.mxu0 %v3533_v42  ;;  %1368 = vmatpush.msra.mxu2 %v3150_v16 }
  0xcd   : > { %1327 = vmatpush.msra.mxu1 %v2914_v39  ;;  %1455 = vmatpush.msra.mxu3 %v1454_v37  ;;  %v1379_v39 = vand.u32 4294901760, %v1378_v3  ;;  %vm1721_vm5 = vcmp.lt.s32.totalorder %v3361_v25, 10  ;;  %vm1813_vm13 = vcmp.eq.s32.totalorder %v3361_v25, 1  ;;  %vm1811_vm14 = vcmp.eq.s32.totalorder %v3361_v25, 0 }
  0xce   : > { %1300 = vmatpush.msra.mxu0 %v3534_v26  ;;  %1370 = vmatpush.msra.mxu2 %v3167_v5 }
  0xcf   : > { %1329 = vmatpush.msra.mxu1 %v2927_v57  ;;  %1461 = vmatpush.msra.mxu3 %v1460_v12  ;;  %v3535_v57 = vand.u32 4294901760, %v3014_v36 }
  0xd0   : > { %1302 = vmatmul.f32.vlgmr.msra.gmra.mxu0 %v2935_v18  ;;  %1372 = vmatpush.msra.mxu2 %v3180_v1 }
  0xd1   : > { %1487 = vmatpush.msrb.mxu0 %v3014_v36  ;;  %1331 = vmatpush.msra.mxu1 %v2941_v58  ;;  %v3536_v58 = vand.u32 4294901760, %v3035_v11 }
  0xd2   : > { %1467 = vmatpush.msra.mxu3 %v1466_v41  ;;  %1374 = vmatpush.msra.mxu2 %v3195_v28 }
  0xd3   : > { %1490 = vmatpush.msrb.mxu0 %v3035_v11  ;;  %1333 = vmatpush.msra.mxu1 %v2953_v23  ;;  %v3537_v23 = vand.u32 4294901760, %v3045_v8  ;;  %v2201_v11 = vmov 0  }
  0xd4   : > { %1473 = vmatpush.msra.mxu3 %v1472_v14  ;;  %1380 = vmatmul.f32.vlgmr.msra.gmra.mxu2 %v1379_v39  ;;  %250 = vst.msk [vmem:[#allocation5] sm:$0xff] %vm246_vm0, %v2201_v11 }
  0xd5   : > { %1493 = vmatpush.msrb.mxu0 %v3045_v8  ;;  %1581 = vmatpush.msrb.mxu2 %v3535_v57  ;;  %v3543_v8 = vand.u32 4294901760, %v3123_v7 }
  0xd6   : > { %1335 = vmatpush.msra.mxu1 %v2974_v62  ;;  %1479 = vmatpush.msra.mxu3 %v1478_v9  ;;  %v3538_v62 = vand.u32 4294901760, %v3053_v56 }
  0xd7   : > { %1481 = vmatmul.f32.vlgmr.msra.gmra.mxu3 %v3182_v30  ;;  %1496 = vmatpush.msrb.mxu0 %v3053_v56 }
  0xd8   : > { %1585 = vmatpush.msrb.mxu2 %v3536_v58  ;;  %1648 = vmatpush.msrb.mxu3 %v2987_v46 }
  0xd9   : > { %1337 = vmatpush.msra.mxu1 %v2993_v4  ;;  %1499 = vmatpush.msrb.mxu0 %v3064_v29  ;;  %v3541_v4 = vand.u32 4294901760, %v3097_v0 }
  0xda   : > { %1339 = vmatmul.f32.vlgmr.msra.gmra.mxu1 %v2935_v18  ;;  %1589 = vmatpush.msrb.mxu2 %v3537_v23  ;;  %v3539_v18 = vand.u32 4294901760, %v3064_v29 }
  0xdb   : > { %1540 = vmatpush.msrb.mxu1 %v2987_v46  ;;  %1650 = vmatpush.msrb.mxu3 %v3006_v24  ;;  %v3540_v46 = vand.u32 4294901760, %v3083_v13 }
  0xdc   : > { %1502 = vmatpush.msrb.mxu0 %v3083_v13  ;;  %1593 = vmatpush.msrb.mxu2 %v3538_v62 }
  0xdd   : > { %1542 = vmatpush.msrb.mxu1 %v3006_v24  ;;  %1652 = vmatpush.msrb.mxu3 %v3023_v61  ;;  %v3346_v24 = vld [vmem:[%s241_s10] sm:$0xff] }
  0xde   : > { %1505 = vmatpush.msrb.mxu0 %v3097_v0  ;;  %1597 = vmatpush.msrb.mxu2 %v3539_v18  ;;  %v2202_v18 = vmov -inf   ;;  %vm1782_vm9 = vcmp.ge.s32.totalorder %v3346_v24, 0 }
  0xdf   : > { %1544 = vmatpush.msrb.mxu1 %v3023_v61  ;;  %1654 = vmatpush.msrb.mxu3 %v3028_v52  ;;  %v3542_v61 = vand.u32 4294901760, %v3111_v32  ;;  %247 = vst.msk [vmem:[#allocation2] sm:$0xff] %vm246_vm0, %v2202_v18 }
  0xe0   : > { %1508 = vmatpush.msrb.mxu0 %v3111_v32  ;;  %1601 = vmatpush.msrb.mxu2 %v3540_v46  ;;  %v3545_v32 = vand.u32 4294901760, %v3148_v34 }
  0xe1   : > { %1546 = vmatpush.msrb.mxu1 %v3028_v52  ;;  %1656 = vmatpush.msrb.mxu3 %v3040_v63 }
  0xe2   : > { %1511 = vmatpush.msrb.mxu0 %v3123_v7  ;;  %1605 = vmatpush.msrb.mxu2 %v3541_v4  ;;  %v358_v29 = vpop.f32.mrf.mxu0 }
  0xe3   : > { %1548 = vmatpush.msrb.mxu1 %v3040_v63  ;;  %1658 = vmatpush.msrb.mxu3 %v3057_v50  ;;  %v3544_v63 = vand.u32 4294901760, %v3135_v53 }
  0xe4   : > { %1514 = vmatpush.msrb.mxu0 %v3135_v53  ;;  %1609 = vmatpush.msrb.mxu2 %v3542_v61 }
  0xe5   : > { %1550 = vmatpush.msrb.mxu1 %v3057_v50  ;;  %1660 = vmatpush.msrb.mxu3 %v3072_v40 }
  0xe6   : > { %1517 = vmatpush.msrb.mxu0 %v3148_v34  ;;  %1613 = vmatpush.msrb.mxu2 %v3543_v8 }
  0xe7   : > { %1552 = vmatpush.msrb.mxu1 %v3072_v40  ;;  %1662 = vmatpush.msrb.mxu3 %v3085_v43 }
  0xe8   : > { %1520 = vmatpush.msrb.mxu0 %v3161_v22  ;;  %1617 = vmatpush.msrb.mxu2 %v3544_v63 }
  0xe9   : > { %1554 = vmatpush.msrb.mxu1 %v3085_v43  ;;  %1664 = vmatpush.msrb.mxu3 %v3099_v20 }
  0xea   : > { %1523 = vmatpush.msrb.mxu0 %v3175_v45  ;;  %1621 = vmatpush.msrb.mxu2 %v3545_v32 }
  0xeb   : > { %1556 = vmatpush.msrb.mxu1 %v3099_v20  ;;  %1666 = vmatpush.msrb.mxu3 %v3113_v33 }
  0xec   : > { %1526 = vmatpush.msrb.mxu0 %v3193_v49  ;;  %1625 = vmatpush.msrb.mxu2 %v1452_v2  ;;  %v459_v36 = vpop.f32.mrf.mxu1 }
  0xed   : > { %1558 = vmatpush.msrb.mxu1 %v3113_v33  ;;  %1668 = vmatpush.msrb.mxu3 %v3125_v35  ;;  %v460_v52 = vadd.f32 %v459_v36, %v358_v29 }
  0xee   : > { %1529 = vmatpush.msrb.mxu0 %v3206_v6  ;;  %1629 = vmatpush.msrb.mxu2 %v1458_v38  ;;  %v513_v56 = vpop.f32.mrf.mxu2  ;;  %v552_v40 = vpop.f32.mrf.mxu3 }
  0xef   : > { %1560 = vmatpush.msrb.mxu1 %v3125_v35  ;;  %1670 = vmatpush.msrb.mxu3 %v3137_v21  ;;  %v514_v50 = vadd.f32 %v513_v56, %v460_v52 }
  0xf0   : > { %1532 = vmatpush.msrb.mxu0 %v3220_v17  ;;  %1633 = vmatpush.msrb.mxu2 %v1464_v31 }
  0xf1   : > { %1562 = vmatpush.msrb.mxu1 %v3137_v21  ;;  %1672 = vmatpush.msrb.mxu3 %v3150_v16  ;;  %v553_v13 = vadd.f32 %v552_v40, %v514_v50 }
  0xf2   : > { %1535 = vmatmul.f32.vlgmr.msrb.gmra.mxu0 %v3209_v27  ;;  %1637 = vmatpush.msrb.mxu2 %v1470_v54 }
  0xf3   : > { %1564 = vmatpush.msrb.mxu1 %v3150_v16  ;;  %1674 = vmatpush.msrb.mxu3 %v3167_v5  ;;  %v621_v43 = vpop.f32.mrf.mxu0 }
  0xf4   : > { %1641 = vmatpush.msrb.mxu2 %v1476_v15  ;;  %2040 = vset.pattern.permute.xlu0 %v2201_v11  ;;  %v622_v0 = vadd.f32 %v621_v43, %v553_v13 }
  0xf5   : > { %1566 = vmatpush.msrb.mxu1 %v3167_v5  ;;  %1676 = vmatpush.msrb.mxu3 %v3180_v1 }
  0xf6   : > { %1643 = vmatmul.f32.vlgmr.msrb.gmra.mxu2 %v3182_v30  ;;  %1690 = vperm.xlu0 %2040, %v3346_v24   ;;  %v658_v20 = vpop.f32.mrf.mxu1 }
  0xf7   : > { %1568 = vmatpush.msrb.mxu1 %v3180_v1  ;;  %1678 = vmatpush.msrb.mxu3 %v3195_v28  ;;  %v659_v33 = vadd.f32 %v658_v20, %v622_v0  ;;  %v699_v7 = vpop.f32.mrf.mxu2 }
  0xf8   : > { %1680 = vmatmul.f32.vlgmr.msrb.gmra.mxu3 %v3182_v30  ;;  %2041 = vset.pattern.permute.xlu1 %v2201_v11 }
  0xf9   : > { %1570 = vmatpush.msrb.mxu1 %v3195_v28  ;;  %v700_v35 = vadd.f32 %v699_v7, %v659_v33 }
  0xfa   : > { %1574 = vmatmul.f32.vlgmr.msrb.gmra.mxu1 %v1377_v10  ;;  %v800_v45 = vpop.f32.mrf.mxu3 }
  0xfb   : > { %v801_v21 = vadd.f32 %v800_v45, %v700_v35  ;;  %v2203_v45 = vmov 0.0  }
  0xfc   : > { %248 = vst.msk [vmem:[#allocation3] sm:$0xff] %vm246_vm0, %v2203_v45 }
  0xfd   : > { %249 = vst.msk [vmem:[#allocation4] sm:$0xff] %vm246_vm0, %v2203_v45 }
 0x109   : > { %v854_v53 = vpop.f32.mrf.mxu0 }
 0x10a   : > { %v855_v16 = vadd.f32 %v854_v53, %v801_v21  ;;  %v1741_v53 = vld [vmem:[#allocation2] sm:$0xff] }
 0x113   : > { %v893_v34 = vpop.f32.mrf.mxu1  ;;  %v962_v5 = vpop.f32.mrf.mxu2 }
 0x114   : > { %v894_v22 = vadd.f32 %v893_v34, %v855_v16 }
 0x116   : > { %v963_v1 = vadd.f32 %v962_v5, %v894_v22  ;;  %v999_v30 = vpop.f32.mrf.mxu3 }
 0x118   : > { %v1000_v49 = vadd.f32 %v999_v30, %v963_v1 }
 0x12b   : > { %v1040_v2 = vpop.f32.mrf.mxu0 }
 0x12c   : > { %v1041_v38 = vadd.f32 %v1040_v2, %v1000_v49 }
 0x135   : > { %v1141_v28 = vpop.f32.mrf.mxu1  ;;  %v1195_v27 = vpop.f32.mrf.mxu2 }
 0x136   : > { %v1142_v6 = vadd.f32 %v1141_v28, %v1041_v38 }
 0x138   : > { %v1196_v60 = vadd.f32 %v1195_v27, %v1142_v6  ;;  %v1234_v44 = vpop.f32.mrf.mxu3 }
 0x13a   : > { %v1235_v17 = vadd.f32 %v1234_v44, %v1196_v60 }
 0x14d   : > { %v1303_v31 = vpop.f32.mrf.mxu0 }
 0x14e   : > { %v1304_v51 = vadd.f32 %v1303_v31, %v1235_v17 }
 0x157   : > { %v1340_v59 = vpop.f32.mrf.mxu1  ;;  %v1381_v54 = vpop.f32.mrf.mxu2 }
 0x158   : > { %v1341_v48 = vadd.f32 %v1340_v59, %v1304_v51  ;;  %v1743_v59 = vld [vmem:[#allocation3] sm:$0xff] }
 0x15a   : > { %v1382_v10 = vadd.f32 %v1381_v54, %v1341_v48  ;;  %v1482_v37 = vpop.f32.mrf.mxu3 }
 0x15c   : > { %v1483_v15 = vadd.f32 %v1482_v37, %v1382_v10 }
 0x168   : > { %v3363_v26 = vpop.permute.xlu0 %1690 }
 0x169   : > { %vm1692_vm1 = vcmp.eq.s32.totalorder %v3361_v25, %v3363_v26 }
 0x16f   : > { %v1536_v19 = vpop.f32.mrf.mxu0 }
 0x170   : > { %v1537_v12 = vadd.f32 %v1536_v19, %v1483_v15 }
 0x177   : > { %v1575_v42 = vpop.f32.mrf.mxu1 }
 0x178   : > { %v1576_v3 = vadd.f32 %v1575_v42, %v1537_v12  ;;  %v1762_v12 = vld [vmem:[#allocation5] sm:$0xff] }
 0x179   : > { %v1644_v41 = vpop.f32.mrf.mxu2 }
 0x17a   : > { %v1645_v55 = vadd.f32 %v1644_v41, %v1576_v3  ;;  %v1766_v41 = vld [vmem:[#allocation4] sm:$0xff] }
 0x17b   : > { %v1681_v14 = vpop.f32.mrf.mxu3 }
 0x17c   : > { %v1682_v39 = vadd.f32 %v1681_v14, %v1645_v55 }
 0x17e   : > { %v1693_v9 = vsel %vm1692_vm1, %v1682_v39, 0.0 }
 0x17f   : > { %1694 = vadd.xlane.f32.xlu0 %v1693_v9 }
 0x1f2   : > { %v1695_v57 = vpop.xlane.xlu0 %1694 }
 0x1f3   : > { %v1696_v58 = vmul.f32 %v1695_v57, %v1695_v57  ;;  %v1951_v50 = vadd.f32 0.9800666, %v1695_v57  ;;  %v1712_v40 = vmul.f32 0.9800666, %v1695_v57  ;;  %v1952_v0 = vadd.f32 -0.039733864, %v1695_v57 }
 0x1f5   : > { %v1697_v23 = vsub.f32 1.0, %v1696_v58  ;;  %vm1716_vm4 = vcmp.gt.f32.partialorder %v1951_v50, 0.0 }
 0x1f7   : > { %v1698_v62 = vmax.f32 %v1697_v23, 0.0 }
 0x1f9   : > { %v1699_v11 = vmin.f32 %v1698_v62, 1.0 }
 0x1fb   : > { %2042 = vrsqrt.f32 %v1699_v11  ;;  %vm1707_vm2 = vcmp.eq.f32.partialorder %v1699_v11, inf  ;;  %v1710_v29 = vand.u32 2147483648, %v1699_v11  ;;  %vm1709_vm3 = vcmp.eq.f32.partialorder %v1699_v11, 0.0 }
 0x201   : > { %v2043_v46 = vpop.eup %2042 }
 0x202   : > { %v1701_v4 = vmul.f32 %v2043_v46, %v1699_v11 }
 0x204   : > { %v1702_v61 = vmul.f32 %v2043_v46, %v1701_v4 }
 0x206   : > { %v1703_v8 = vmul.f32 0.5, %v1702_v61 }
 0x208   : > { %v1704_v63 = vsub.f32 1.5, %v1703_v8 }
 0x20a   : > { %v1705_v32 = vmul.f32 %v2043_v46, %v1704_v63 }
 0x20c   : > { %v1706_v36 = vmul.f32 %v1705_v32, %v1699_v11 }
 0x20e   : > { %v1708_v52 = vsel %vm1707_vm2, %v1699_v11, %v1706_v36 }
 0x20f   : > { %v1711_v56 = vsel %vm1709_vm3, %v1710_v29, %v1708_v52 }
 0x210   : > { %v1713_v13 = vmul.f32 0.19866933, %v1711_v56 }
 0x212   : > { %v1714_v43 = vsub.f32 %v1712_v40, %v1713_v13 }
 0x214   : > { %v1718_v20 = vsel %vm1716_vm4, %v1714_v43, %v1952_v0 }
 0x215   : > { %v1719_v33 = vsel %vm1692_vm1, %v1718_v20, %v1682_v39 }
 0x216   : > { %v1720_v7 = vmul.f32 30.0, %v1719_v33  ;;  %v1809_v33 = vshrl.u32 %v1684_v47, 7 }
 0x218   : > { %v1722_v35 = vsel %vm1721_vm5, %v1720_v7, -1e+30  ;;  %vm1810_vm12 = vcmp.eq.s32.totalorder %v1809_v33, 0 }
 0x219   : > { %1723 = vmax.xlane.f32.xlu1 %v1722_v35  ;;  %v1767_v44 = vsel %vm1692_vm1, %v1722_v35, 0.0  ;;  %vm1814_vm15 = vmand %vm1810_vm12, %vm1813_vm13 }
 0x28c   : > { %v1724_v21 = vpop.xlane.xlu1 %1723 }
 0x28d   : > { %vm1725_vm6 = vcmp.eq.f32.partialorder %v1722_v35, %v1724_v21  ;;  %v1742_v34 = vmax.f32 %v1741_v53, %v1724_v21  ;;  %vm1761_vm8 = vcmp.gt.f32.partialorder %v1724_v21, %v1741_v53 }
 0x28e   : > { %v1726_v16 = vsel %vm1725_vm6, %v3361_v25, 2147483647 }
 0x28f   : > { %v1744_v22 = vsub.f32 %v1741_v53, %v1742_v34  ;;  %1765 = vst.msk [vmem:[#allocation2] sm:$0xff] %vm246_vm0, %v1742_v34  ;;  %1750 = vperm.xlu1 %2041, %v1742_v34   ;;  %v1728_v5 = vshra.s32 %v1726_v16, 16  ;;  %v1727_v6 = vand.u32 65535, %v1726_v16 }
 0x291   : > { %v1730_v1 = vcvt.s32.f32 %v1728_v5  ;;  %v1729_v27 = vcvt.s32.f32 %v1727_v6  ;;  %v1745_v31 = vmul.f32 1.442695, %v1744_v22 }
 0x293   : > { %1731 = vmin.xlane.f32.xlu2 %v1730_v1 }
 0x296   : > { %v1775_v23 = vld [vmem:[#allocation2] sm:$0xff] }
 0x301   : > { %v1751_v30 = vpop.permute.xlu1 %1750 }
 0x302   : > { %v1753_v2 = vsub.f32 %v1722_v35, %v1751_v30 }
 0x304   : > { %v1754_v49 = vmul.f32 1.442695, %v1753_v2 }
 0x306   : > { %2044 = vpow2.f32 %v1754_v49  ;;  %v1732_v38 = vpop.xlane.xlu2 %1731 }
 0x307   : > { %vm1733_vm7 = vcmp.eq.f32.partialorder %v1730_v1, %v1732_v38  ;;  %2046 = vpow2.f32 %v1745_v31  ;;  %v1738_v10 = vcvt.f32.s32 %v1732_v38 }
 0x308   : > { %v1734_v60 = vsel %vm1733_vm7, %v1729_v27, inf }
 0x309   : > { %v1739_v19 = vshll.u32 %v1738_v10, 16 }
 0x30c   : > { %v2045_v28 = vpop.eup %2044 }
 0x30d   : > { %1756 = vadd.xlane.f32.xlu2 %v2045_v28  ;;  %v2047_v17 = vpop.eup %2046 }
 0x30e   : > { %v1747_v51 = vmul.f32 %v2047_v17, %v1743_v59 }
 0x315   : > { %1735 = vmin.xlane.f32.xlu2 %v1734_v60 }
 0x31d   : > { %1768 = vadd.xlane.f32.xlu2 %v1767_v44 }
 0x380   : > { %v1757_v48 = vpop.xlane.xlu2 %1756 }
 0x381   : > { %v1758_v54 = vadd.f32 %v1757_v48, %v1747_v51 }
 0x383   : > { %1760 = vst.msk [vmem:[#allocation3] sm:$0xff] %vm246_vm0, %v1758_v54 }
 0x388   : > { %v1736_v37 = vpop.xlane.xlu2 %1735 }
 0x389   : > { %v1737_v15 = vcvt.f32.s32 %v1736_v37 }
 0x38a   : > { %v1776_v42 = vld [vmem:[#allocation3] sm:$0xff] }
 0x38b   : > { %v1740_v3 = vadd.s32 %v1739_v19, %v1737_v15  ;;  %2048 = vlog2.f32 %v1776_v42 }
 0x38d   : > { %v1763_v26 = vsel %vm1761_vm8, %v1740_v3, %v1762_v12 }
 0x38e   : > { %1764 = vst.msk [vmem:[#allocation5] sm:$0xff] %vm246_vm0, %v1763_v26 }
 0x390   : > { %v1769_v55 = vpop.xlane.xlu2 %1768 }
 0x391   : > { %v1770_v14 = vadd.f32 %v1769_v55, %v1766_v41  ;;  %v2049_v39 = vpop.eup %2048 }
 0x392   : > { %v1778_v57 = vmul.f32 0.6931472, %v2049_v39 }
 0x393   : > { %1771 = vst.msk [vmem:[#allocation4] sm:$0xff] %vm246_vm0, %v1770_v14 }
 0x394   : > { %v1779_v11 = vadd.f32 %v1778_v57, %v1775_v23 }
 0x395   : > { %v1783_v9 = vld [vmem:[#allocation5] sm:$0xff] }
 0x396   : > { %vm1784_vm10 = vcmp.eq.s32.totalorder %v1783_v9, %v3346_v24 }
 0x397   : > { %vm1796_vm11 = vmand %vm1782_vm9, %vm1784_vm10 }
 0x398   : > { %v1797_v58 = vsel %vm1796_vm11, 1.0, %v2203_v45 }
 0x399   : > { %v1798_v62 = vsel %vm246_vm0, %v1797_v58, 0.0 }
 0x39a   : > { %1799 = vadd.xlane.f32.xlu1 %v1798_v62  ;;  %v1780_v18 = vld [vmem:[#allocation4] sm:$0xff] }
 0x39b   : > { %v1781_v46 = vsub.f32 %v1779_v11, %v1780_v18 }
 0x39d   : > { %v1785_v4 = vsel %vm1782_vm9, %v1781_v46, 0.0 }
 0x39e   : > { %v1786_v61 = vsel %vm246_vm0, %v1785_v4, 0.0  ;;  %vm1812_vm0 = vmand %vm1810_vm12, %vm1811_vm14 }
 0x39f   : > { %1787 = vadd.xlane.f32.xlu2 %v1786_v61 }
 0x40d   : > { %v1800_v8 = vpop.xlane.xlu1 %1799 }
 0x40e   : > { %v1801_v63 = vrot.slane %v1800_v8, 4 }
 0x410   : > { %v1802_v32 = vadd.f32 %v1801_v63, %v1800_v8 }
 0x412   : > { %v1803_v36 = vrot.slane %v1802_v32, 2  ;;  %v1788_v24 = vpop.xlane.xlu2 %1787 }
 0x413   : > { %v1789_v29 = vrot.slane %v1788_v24, 4 }
 0x414   : > { %v1804_v56 = vadd.f32 %v1803_v36, %v1802_v32 }
 0x415   : > { %v1790_v52 = vadd.f32 %v1789_v29, %v1788_v24 }
 0x416   : > { %v1805_v13 = vrot.slane %v1804_v56, 1 }
 0x417   : > { %v1791_v50 = vrot.slane %v1790_v52, 2 }
 0x418   : > { %v1806_v20 = vadd.f32 %v1805_v13, %v1804_v56 }
 0x419   : > { %v1792_v40 = vadd.f32 %v1791_v50, %v1790_v52 }
 0x41b   : > { %v1793_v43 = vrot.slane %v1792_v40, 1 }
 0x41d   : > { %v1794_v0 = vadd.f32 %v1793_v43, %v1792_v40 }
 0x41f   : > { %1958 = vpush %v1794_v0 }
 0x420   : > { %1960 = vpush %v1806_v20 }
 0x450   : > { %s1959_s27 = spop %1958 }
 0x451   : > { %v1817_v7 = vstv %s1959_s27  ;;  %s1961_s6 = spop %1960 }
 0x452   : > { %v1815_v47 = vstv %s1961_s6 }
 0x453   : > { %v1816_v35 = vsel %vm1814_vm15, %v1815_v47, 0.0 }
 0x454   : > { %v1818_v45 = vsel %vm1812_vm0, %v1817_v7, %v1816_v35 }
 0x455   : > { %1819 = vst [vmem:[%s237_s25] sm:$0xff] %v1818_v45 }
 0x456   : > { %2137 = shalt.err (!%p2134_p0)
}
 0x457   : > { %1968 = dma.vmem_to_hbm [thread:$0]  (%p2295_p4), %s1834_s26, 128, %s1836_s30, %s1821_s15  }
 0x458 PF: > { %s1847_s28 = sand.u32 1, %s2176_s12   ;;  %p1979_p2 = pnand %p1942_p6, %p2303_p7 }
 0x459   : > { %s1848_s21 = scalar_lea.sflag [#allocation8], %s1847_s28 }
 0x45a   : > { %p1980_p5 = pneg %p1979_p2 }
 0x45c   : > { %2171 = dma.done.wait (%p1980_p5), %s1848_s21, 128  }
 0x45d   : > { %2173 = vsyncadd (%p1980_p5), %s1848_s21, 4294967168  ;;  %s20_s17 = sadd.s32 1, %s2196_s17   ;;  %s3546_s12 = smov %s2180_s13 }
 0x45e   : > { %p17_p8 = scmp.ge.s32.totalorder %s20_s17, 4   ;;  %s3547_s13 = smov %s2184_s14 }
 0x45f   : > { %s3548_s14 = smov %s2301_s8  ;;  %s3549_s15 = smov %s2192_s16 }
 0x460   : > { %s3550_s16 = smov %s3552_s29  ;;  %19 = sbr.rel (!%p17_p8) target bundleno = 7 (0x7), region = 93 }
 0x465   :  { %1854 = vsyncpa [#allocation7], 1 }
 0x466   :  { %1856 = vsyncpa [#allocation7 + $0x1], 1 }
 0x467   :  { %1857 = vsyncpa [#allocation10], 1 }
 0x468   :  { %1858 = vsyncpa [#allocation8], 1 }
 0x469   :  { %1860 = vsyncpa [#allocation8 + $0x1], 1 }

</bundles_post_ra>
